<compile_context>
chip_gen: v6e
topology: v6e:2x2x1
jax: 0.10.0
libtpu: 0.0.40
codegen_flags: <defaults>
</compile_context>

<pallas_src>
import jax
import jax.numpy as jnp
from jax import lax
from jax.experimental import pallas as pl
from jax.experimental.pallas import tpu as pltpu

OUT_CH = 16      # out_channels_def in the PyTorch DenseBlock
N_LAYERS = 3     # three DenseConv2d layers


def _make_dense_block_kernel(cin0, h, w):
    """Build the fused kernel for a given input-channel count / spatial size."""
    hp, wp = h + 2, w + 2            # padded spatial frame ('same' 3x3 conv)
    hwp = hp * wp                    # flattened padded frame length
    guard = wp + 1                   # max |flat tap offset| for a 3x3 kernel
    fw = hwp + 2 * guard             # guarded flat width of the scratch rows
    c_total = cin0 + N_LAYERS * OUT_CH

    # Flat offsets of the 9 taps of a 3x3 'same' conv in the padded frame.
    offsets = [(ky - 1) * wp + (kx - 1) for ky in range(3) for kx in range(3)]

    def kernel(x_ref, w1_ref, w2_ref, w3_ref, b_ref, m_ref, o_ref, feat_ref):
        # feat_ref: (C_pad, fw) scratch holding the growing concatenated
        # feature map: channels on sublanes, flat padded spatial (plus guard
        # bands) on lanes.
        feat_ref[...] = jnp.zeros_like(feat_ref)
        # Place the (already zero-padded, flattened) input channels.
        feat_ref[0:cin0, guard:guard + hwp] = x_ref[0]

        mask = m_ref[...]                       # (1, hwp): 1 interior / 0 border
        w_refs = (w1_ref, w2_ref, w3_ref)

        cin = cin0
        for layer in range(N_LAYERS):
            # im2col patch from 9 statically shifted views -> single matmul
            # with K = 9*cin (instead of 9 tiny K=cin matmuls).
            pieces = [feat_ref[0:cin, guard + off:guard + off + hwp]
                      for off in offsets]
            patch = jnp.concatenate(pieces, axis=0)            # (9*cin, hwp)
            acc = jnp.dot(w_refs[layer][...], patch,
                          preferred_element_type=jnp.float32)  # (OUT_CH, hwp)
            acc = acc + b_ref[:, layer:layer + 1]              # bias
            acc = jnp.maximum(acc, 0.0)                        # ReLU (is_last=False)
            acc = acc * mask                                   # zero the pad border
            # torch.cat([x, out], dim=1): append as new channel rows.
            feat_ref[cin:cin + OUT_CH, guard:guard + hwp] = acc
            cin += OUT_CH

        # Lane-dense output store: (C_total, hwp) with hwp = 324 lanes.
        o_ref[0] = feat_ref[0:c_total, guard:guard + hwp]

    return kernel, hwp, fw, c_total


def dense_block_forward(x_nchw, params):
    """DenseBlock forward: 3 x (conv3x3 s1 p1 + ReLU, concat on channels)."""
    n, cin0, h, w = x_nchw.shape
    hp, wp = h + 2, w + 2
    kernel, hwp, fw, c_total = _make_dense_block_kernel(cin0, h, w)
    c_pad = ((c_total + 7) // 8) * 8

    # --- cheap wrapper glue (input-sized only): zero-pad + flatten spatial ---
    xp = jnp.pad(x_nchw.astype(jnp.float32), ((0, 0), (0, 0), (1, 1), (1, 1)))
    x_flat = xp.reshape(n, cin0, hwp)

    # Weights (Cout, Cin, 3, 3) -> (Cout, 9*Cin) with K ordered (tap, channel),
    # matching the in-kernel patch layout.  Biases packed as (Cout, 3).
    w_mats, biases = [], []
    for wgt, b in params:
        cout, cin = wgt.shape[0], wgt.shape[1]
        w_mats.append(jnp.transpose(wgt, (0, 2, 3, 1))
                      .reshape(cout, 9 * cin).astype(jnp.float32))
        biases.append(b.astype(jnp.float32))
    b_mat = jnp.stack(biases, axis=1)                           # (OUT_CH, 3)

    # Interior mask over the flat padded frame (zeros the conv-pad border so
    # each layer's output doubles as zero padding for the next layer).
    rr = jnp.arange(hwp) // wp
    cc = jnp.arange(hwp) % wp
    mask = (((rr >= 1) & (rr <= h) & (cc >= 1) & (cc <= w))
            .astype(jnp.float32).reshape(1, hwp))

    out_flat = pl.pallas_call(
        kernel,
        out_shape=jax.ShapeDtypeStruct((n, c_total, hwp), jnp.float32),
        grid_spec=pltpu.PrefetchScalarGridSpec(
            num_scalar_prefetch=0,
            grid=(n,),
            in_specs=[
                pl.BlockSpec((1, cin0, hwp), lambda i: (i, 0, 0)),
                pl.BlockSpec(w_mats[0].shape, lambda i: (0, 0)),
                pl.BlockSpec(w_mats[1].shape, lambda i: (0, 0)),
                pl.BlockSpec(w_mats[2].shape, lambda i: (0, 0)),
                pl.BlockSpec(b_mat.shape, lambda i: (0, 0)),
                pl.BlockSpec(mask.shape, lambda i: (0, 0)),
            ],
            out_specs=pl.BlockSpec((1, c_total, hwp), lambda i: (i, 0, 0)),
            scratch_shapes=[pltpu.VMEM((c_pad, fw), jnp.float32)],
        ),
        compiler_params=pltpu.CompilerParams(
            dimension_semantics=("parallel",),
        ),
    )(x_flat, w_mats[0], w_mats[1], w_mats[2], b_mat, mask)

    # Un-flatten the padded frame and drop the 1-pixel border -> NCHW output.
    out = out_flat.reshape(n, c_total, hp, wp)[:, :, 1:h + 1, 1:w + 1]
    return out


def init_dense_block_params(key, in_channels, kernel_size=3,
                            out_channels_def=OUT_CH):
    """Deterministic init mimicking nn.Conv2d default (U(+/- 1/sqrt(fan_in)))."""
    params = []
    cin = in_channels
    for _ in range(N_LAYERS):
        key, kw, kb = jax.random.split(key, 3)
        fan_in = cin * kernel_size * kernel_size
        bound = 1.0 / jnp.sqrt(jnp.float32(fan_in))
        wgt = jax.random.uniform(
            kw, (out_channels_def, cin, kernel_size, kernel_size),
            minval=-bound, maxval=bound, dtype=jnp.float32)
        b = jax.random.uniform(
            kb, (out_channels_def,), minval=-bound, maxval=bound,
            dtype=jnp.float32)
        params.append((wgt, b))
        cin = cin + out_channels_def
    return params


def dense_block_reference(x, params):
    """Pure-JAX reference (matches the PyTorch module, stride=1, pad=1)."""
    out = x
    for wgt, b in params:
        conv = lax.conv_general_dilated(
            out, wgt, window_strides=(1, 1), padding=((1, 1), (1, 1)),
            dimension_numbers=("NCHW", "OIHW", "NCHW"),
            precision=lax.Precision.HIGHEST)
        conv = jnp.maximum(conv + b[None, :, None, None], 0.0)
        out = jnp.concatenate([out, conv], axis=1)
    return out


if __name__ == "__main__":
    key = jax.random.PRNGKey(0)
    key, kx = jax.random.split(key)

    # Small shapes: batch=2, in_channels=4, spatial=16x16 (NCHW like PyTorch).
    N, C, H, W = 2, 4, 16, 16
    x = jax.random.normal(kx, (N, C, H, W), dtype=jnp.float32)
    params = init_dense_block_params(key, in_channels=C, kernel_size=3)

    fwd = jax.jit(dense_block_forward)
    y = jax.block_until_ready(fwd(x, params))

    # Output channels: C + 3*16 = 52; spatial preserved (stride 1, pad 1).
    assert y.shape == (N, C + 3 * OUT_CH, H, W), y.shape
    assert y.dtype == jnp.float32

    # Correctness vs a pure-JAX reference of the PyTorch module.
    y_ref = dense_block_reference(x, params)
    max_err = float(jnp.max(jnp.abs(y - y_ref)))
    assert max_err < 1e-3, f"max abs err {max_err}"

    print("KERNEL_OK")
</pallas_src>

<mosaic_0001>
module attributes {stable_mosaic.version = 11 : i64} {
  func.func @kernel(%arg0: i32, %arg1: memref<1x4x324xf32, #tpu.memory_space<vmem>>, %arg2: memref<16x36xf32, #tpu.memory_space<vmem>>, %arg3: memref<16x180xf32, #tpu.memory_space<vmem>>, %arg4: memref<16x324xf32, #tpu.memory_space<vmem>>, %arg5: memref<16x3xf32, #tpu.memory_space<vmem>>, %arg6: memref<1x324xf32, #tpu.memory_space<vmem>>, %arg7: memref<1x52x324xf32, #tpu.memory_space<vmem>>, %arg8: memref<56x362xf32, #tpu.memory_space<vmem>>) attributes {dimension_semantics = [#tpu.dimension_semantics<parallel>], iteration_bounds = array<i64: 2>, scalar_prefetch = 0 : i64, scratch_operands = 1 : i64, tpu.core_type = #tpu.core_type<tc>, window_params = [{transform_indices = @transform_0, window_bounds = array<i64: 1, 4, 324>}, {pipeline_mode = #tpu.pipeline_mode<synchronous>, transform_indices = @transform_1, window_bounds = array<i64: 16, 36>}, {pipeline_mode = #tpu.pipeline_mode<synchronous>, transform_indices = @transform_2, window_bounds = array<i64: 16, 180>}, {pipeline_mode = #tpu.pipeline_mode<synchronous>, transform_indices = @transform_3, window_bounds = array<i64: 16, 324>}, {pipeline_mode = #tpu.pipeline_mode<synchronous>, transform_indices = @transform_4, window_bounds = array<i64: 16, 3>}, {pipeline_mode = #tpu.pipeline_mode<synchronous>, transform_indices = @transform_5, window_bounds = array<i64: 1, 324>}, {transform_indices = @transform_6, window_bounds = array<i64: 1, 52, 324>}]} {
    %cst = arith.constant 0.000000e+00 : f32
    %0 = vector.broadcast %cst : f32 to vector<56x362xf32>
    %c0 = arith.constant 0 : index
    %c0_0 = arith.constant 0 : index
    %1 = vector.load %arg8[%c0, %c0_0] : memref<56x362xf32, #tpu.memory_space<vmem>>, vector<56x362xf32>
    tpu.vector_store %arg8[%c0, %c0_0], %0 {strides = array<i32>} : memref<56x362xf32, #tpu.memory_space<vmem>>, vector<56x362xf32>,
    %c0_1 = arith.constant 0 : index
    %c0_2 = arith.constant 0 : index
    %c0_3 = arith.constant 0 : index
    %2 = vector.load %arg1[%c0_1, %c0_2, %c0_3] : memref<1x4x324xf32, #tpu.memory_space<vmem>>, vector<1x4x324xf32>
    %3 = vector.shape_cast %2 : vector<1x4x324xf32> to vector<4x324xf32>
    %c0_4 = arith.constant 0 : index
    %c19 = arith.constant 19 : index
    %4 = vector.load %arg8[%c0_4, %c19] : memref<56x362xf32, #tpu.memory_space<vmem>>, vector<4x324xf32>
    tpu.vector_store %arg8[%c0_4, %c19], %3 {strides = array<i32>} : memref<56x362xf32, #tpu.memory_space<vmem>>, vector<4x324xf32>,
    %c0_5 = arith.constant 0 : index
    %c0_6 = arith.constant 0 : index
    %5 = vector.load %arg6[%c0_5, %c0_6] : memref<1x324xf32, #tpu.memory_space<vmem>>, vector<1x324xf32>
    %c0_7 = arith.constant 0 : index
    %c0_8 = arith.constant 0 : index
    %6 = vector.load %arg8[%c0_7, %c0_8] : memref<56x362xf32, #tpu.memory_space<vmem>>, vector<4x324xf32>
    %c0_9 = arith.constant 0 : index
    %c1 = arith.constant 1 : index
    %7 = vector.load %arg8[%c0_9, %c1] : memref<56x362xf32, #tpu.memory_space<vmem>>, vector<4x324xf32>
    %c0_10 = arith.constant 0 : index
    %c2 = arith.constant 2 : index
    %8 = vector.load %arg8[%c0_10, %c2] : memref<56x362xf32, #tpu.memory_space<vmem>>, vector<4x324xf32>
    %c0_11 = arith.constant 0 : index
    %c18 = arith.constant 18 : index
    %9 = vector.load %arg8[%c0_11, %c18] : memref<56x362xf32, #tpu.memory_space<vmem>>, vector<4x324xf32>
    %c0_12 = arith.constant 0 : index
    %c19_13 = arith.constant 19 : index
    %10 = vector.load %arg8[%c0_12, %c19_13] : memref<56x362xf32, #tpu.memory_space<vmem>>, vector<4x324xf32>
    %c0_14 = arith.constant 0 : index
    %c20 = arith.constant 20 : index
    %11 = vector.load %arg8[%c0_14, %c20] : memref<56x362xf32, #tpu.memory_space<vmem>>, vector<4x324xf32>
    %c0_15 = arith.constant 0 : index
    %c36 = arith.constant 36 : index
    %12 = vector.load %arg8[%c0_15, %c36] : memref<56x362xf32, #tpu.memory_space<vmem>>, vector<4x324xf32>
    %c0_16 = arith.constant 0 : index
    %c37 = arith.constant 37 : index
    %13 = vector.load %arg8[%c0_16, %c37] : memref<56x362xf32, #tpu.memory_space<vmem>>, vector<4x324xf32>
    %c0_17 = arith.constant 0 : index
    %c38 = arith.constant 38 : index
    %14 = vector.load %arg8[%c0_17, %c38] : memref<56x362xf32, #tpu.memory_space<vmem>>, vector<4x324xf32>
    %15 = tpu.concatenate %6, %7, %8, %9, %10, %11, %12, %13, %14 in 0 : vector<4x324xf32>, vector<4x324xf32>, vector<4x324xf32>, vector<4x324xf32>, vector<4x324xf32>, vector<4x324xf32>, vector<4x324xf32>, vector<4x324xf32>, vector<4x324xf32> -> vector<36x324xf32>
    %c0_18 = arith.constant 0 : index
    %c0_19 = arith.constant 0 : index
    %16 = vector.load %arg2[%c0_18, %c0_19] : memref<16x36xf32, #tpu.memory_space<vmem>>, vector<16x36xf32>
    %cst_20 = arith.constant dense<0.000000e+00> : vector<16x324xf32>
    %17 = tpu.matmul %16, %15, %cst_20 {dimension_numbers = #tpu.dot_dimension_numbers<[1], [0], [0], [1], [0, 0, 1, 1], [], []>} : vector<16x36xf32>, vector<36x324xf32>, vector<16x324xf32> -> vector<16x324xf32>
    %c0_21 = arith.constant 0 : index
    %c0_22 = arith.constant 0 : index
    %18 = vector.load %arg5[%c0_21, %c0_22] : memref<16x3xf32, #tpu.memory_space<vmem>>, vector<16x1xf32>
    %19 = vector.broadcast %18 : vector<16x1xf32> to vector<16x324xf32>
    %20 = arith.addf %17, %19 : vector<16x324xf32>
    %cst_23 = arith.constant 0.000000e+00 : f32
    %21 = vector.broadcast %cst_23 : f32 to vector<16x324xf32>
    %22 = arith.maximumf %20, %21 : vector<16x324xf32>
    %23 = vector.broadcast %5 : vector<1x324xf32> to vector<16x324xf32>
    %24 = arith.mulf %22, %23 : vector<16x324xf32>
    %c4 = arith.constant 4 : index
    %c19_24 = arith.constant 19 : index
    %25 = vector.load %arg8[%c4, %c19_24] : memref<56x362xf32, #tpu.memory_space<vmem>>, vector<16x324xf32>
    tpu.vector_store %arg8[%c4, %c19_24], %24 {strides = array<i32>} : memref<56x362xf32, #tpu.memory_space<vmem>>, vector<16x324xf32>,
    %c0_25 = arith.constant 0 : index
    %c0_26 = arith.constant 0 : index
    %26 = vector.load %arg8[%c0_25, %c0_26] : memref<56x362xf32, #tpu.memory_space<vmem>>, vector<20x324xf32>
    %c0_27 = arith.constant 0 : index
    %c1_28 = arith.constant 1 : index
    %27 = vector.load %arg8[%c0_27, %c1_28] : memref<56x362xf32, #tpu.memory_space<vmem>>, vector<20x324xf32>
    %c0_29 = arith.constant 0 : index
    %c2_30 = arith.constant 2 : index
    %28 = vector.load %arg8[%c0_29, %c2_30] : memref<56x362xf32, #tpu.memory_space<vmem>>, vector<20x324xf32>
    %c0_31 = arith.constant 0 : index
    %c18_32 = arith.constant 18 : index
    %29 = vector.load %arg8[%c0_31, %c18_32] : memref<56x362xf32, #tpu.memory_space<vmem>>, vector<20x324xf32>
    %c0_33 = arith.constant 0 : index
    %c19_34 = arith.constant 19 : index
    %30 = vector.load %arg8[%c0_33, %c19_34] : memref<56x362xf32, #tpu.memory_space<vmem>>, vector<20x324xf32>
    %c0_35 = arith.constant 0 : index
    %c20_36 = arith.constant 20 : index
    %31 = vector.load %arg8[%c0_35, %c20_36] : memref<56x362xf32, #tpu.memory_space<vmem>>, vector<20x324xf32>
    %c0_37 = arith.constant 0 : index
    %c36_38 = arith.constant 36 : index
    %32 = vector.load %arg8[%c0_37, %c36_38] : memref<56x362xf32, #tpu.memory_space<vmem>>, vector<20x324xf32>
    %c0_39 = arith.constant 0 : index
    %c37_40 = arith.constant 37 : index
    %33 = vector.load %arg8[%c0_39, %c37_40] : memref<56x362xf32, #tpu.memory_space<vmem>>, vector<20x324xf32>
    %c0_41 = arith.constant 0 : index
    %c38_42 = arith.constant 38 : index
    %34 = vector.load %arg8[%c0_41, %c38_42] : memref<56x362xf32, #tpu.memory_space<vmem>>, vector<20x324xf32>
    %35 = tpu.concatenate %26, %27, %28, %29, %30, %31, %32, %33, %34 in 0 : vector<20x324xf32>, vector<20x324xf32>, vector<20x324xf32>, vector<20x324xf32>, vector<20x324xf32>, vector<20x324xf32>, vector<20x324xf32>, vector<20x324xf32>, vector<20x324xf32> -> vector<180x324xf32>
    %c0_43 = arith.constant 0 : index
    %c0_44 = arith.constant 0 : index
    %36 = vector.load %arg3[%c0_43, %c0_44] : memref<16x180xf32, #tpu.memory_space<vmem>>, vector<16x180xf32>
    %cst_45 = arith.constant dense<0.000000e+00> : vector<16x324xf32>
    %37 = tpu.matmul %36, %35, %cst_45 {dimension_numbers = #tpu.dot_dimension_numbers<[1], [0], [0], [1], [0, 0, 1, 1], [], []>} : vector<16x180xf32>, vector<180x324xf32>, vector<16x324xf32> -> vector<16x324xf32>
    %c0_46 = arith.constant 0 : index
    %c1_47 = arith.constant 1 : index
    %38 = vector.load %arg5[%c0_46, %c1_47] : memref<16x3xf32, #tpu.memory_space<vmem>>, vector<16x1xf32>
    %39 = vector.broadcast %38 : vector<16x1xf32> to vector<16x324xf32>
    %40 = arith.addf %37, %39 : vector<16x324xf32>
    %cst_48 = arith.constant 0.000000e+00 : f32
    %41 = vector.broadcast %cst_48 : f32 to vector<16x324xf32>
    %42 = arith.maximumf %40, %41 : vector<16x324xf32>
    %43 = vector.broadcast %5 : vector<1x324xf32> to vector<16x324xf32>
    %44 = arith.mulf %42, %43 : vector<16x324xf32>
    %c20_49 = arith.constant 20 : index
    %c19_50 = arith.constant 19 : index
    %45 = vector.load %arg8[%c20_49, %c19_50] : memref<56x362xf32, #tpu.memory_space<vmem>>, vector<16x324xf32>
    tpu.vector_store %arg8[%c20_49, %c19_50], %44 {strides = array<i32>} : memref<56x362xf32, #tpu.memory_space<vmem>>, vector<16x324xf32>,
    %c0_51 = arith.constant 0 : index
    %c0_52 = arith.constant 0 : index
    %46 = vector.load %arg8[%c0_51, %c0_52] : memref<56x362xf32, #tpu.memory_space<vmem>>, vector<36x324xf32>
    %c0_53 = arith.constant 0 : index
    %c1_54 = arith.constant 1 : index
    %47 = vector.load %arg8[%c0_53, %c1_54] : memref<56x362xf32, #tpu.memory_space<vmem>>, vector<36x324xf32>
    %c0_55 = arith.constant 0 : index
    %c2_56 = arith.constant 2 : index
    %48 = vector.load %arg8[%c0_55, %c2_56] : memref<56x362xf32, #tpu.memory_space<vmem>>, vector<36x324xf32>
    %c0_57 = arith.constant 0 : index
    %c18_58 = arith.constant 18 : index
    %49 = vector.load %arg8[%c0_57, %c18_58] : memref<56x362xf32, #tpu.memory_space<vmem>>, vector<36x324xf32>
    %c0_59 = arith.constant 0 : index
    %c19_60 = arith.constant 19 : index
    %50 = vector.load %arg8[%c0_59, %c19_60] : memref<56x362xf32, #tpu.memory_space<vmem>>, vector<36x324xf32>
    %c0_61 = arith.constant 0 : index
    %c20_62 = arith.constant 20 : index
    %51 = vector.load %arg8[%c0_61, %c20_62] : memref<56x362xf32, #tpu.memory_space<vmem>>, vector<36x324xf32>
    %c0_63 = arith.constant 0 : index
    %c36_64 = arith.constant 36 : index
    %52 = vector.load %arg8[%c0_63, %c36_64] : memref<56x362xf32, #tpu.memory_space<vmem>>, vector<36x324xf32>
    %c0_65 = arith.constant 0 : index
    %c37_66 = arith.constant 37 : index
    %53 = vector.load %arg8[%c0_65, %c37_66] : memref<56x362xf32, #tpu.memory_space<vmem>>, vector<36x324xf32>
    %c0_67 = arith.constant 0 : index
    %c38_68 = arith.constant 38 : index
    %54 = vector.load %arg8[%c0_67, %c38_68] : memref<56x362xf32, #tpu.memory_space<vmem>>, vector<36x324xf32>
    %55 = tpu.concatenate %46, %47, %48, %49, %50, %51, %52, %53, %54 in 0 : vector<36x324xf32>, vector<36x324xf32>, vector<36x324xf32>, vector<36x324xf32>, vector<36x324xf32>, vector<36x324xf32>, vector<36x324xf32>, vector<36x324xf32>, vector<36x324xf32> -> vector<324x324xf32>
    %c0_69 = arith.constant 0 : index
    %c0_70 = arith.constant 0 : index
    %56 = vector.load %arg4[%c0_69, %c0_70] : memref<16x324xf32, #tpu.memory_space<vmem>>, vector<16x324xf32>
    %cst_71 = arith.constant dense<0.000000e+00> : vector<16x324xf32>
    %57 = tpu.matmul %56, %55, %cst_71 {dimension_numbers = #tpu.dot_dimension_numbers<[1], [0], [0], [1], [0, 0, 1, 1], [], []>} : vector<16x324xf32>, vector<324x324xf32>, vector<16x324xf32> -> vector<16x324xf32>
    %c0_72 = arith.constant 0 : index
    %c2_73 = arith.constant 2 : index
    %58 = vector.load %arg5[%c0_72, %c2_73] : memref<16x3xf32, #tpu.memory_space<vmem>>, vector<16x1xf32>
    %59 = vector.broadcast %58 : vector<16x1xf32> to vector<16x324xf32>
    %60 = arith.addf %57, %59 : vector<16x324xf32>
    %cst_74 = arith.constant 0.000000e+00 : f32
    %61 = vector.broadcast %cst_74 : f32 to vector<16x324xf32>
    %62 = arith.maximumf %60, %61 : vector<16x324xf32>
    %63 = vector.broadcast %5 : vector<1x324xf32> to vector<16x324xf32>
    %64 = arith.mulf %62, %63 : vector<16x324xf32>
    %c36_75 = arith.constant 36 : index
    %c19_76 = arith.constant 19 : index
    %65 = vector.load %arg8[%c36_75, %c19_76] : memref<56x362xf32, #tpu.memory_space<vmem>>, vector<16x324xf32>
    tpu.vector_store %arg8[%c36_75, %c19_76], %64 {strides = array<i32>} : memref<56x362xf32, #tpu.memory_space<vmem>>, vector<16x324xf32>,
    %c0_77 = arith.constant 0 : index
    %c19_78 = arith.constant 19 : index
    %66 = vector.load %arg8[%c0_77, %c19_78] : memref<56x362xf32, #tpu.memory_space<vmem>>, vector<52x324xf32>
    %c0_79 = arith.constant 0 : index
    %c0_80 = arith.constant 0 : index
    %c0_81 = arith.constant 0 : index
    %67 = vector.load %arg7[%c0_79, %c0_80, %c0_81] : memref<1x52x324xf32, #tpu.memory_space<vmem>>, vector<1x52x324xf32>
    %68 = vector.shape_cast %67 : vector<1x52x324xf32> to vector<52x324xf32>
    %69 = vector.shape_cast %66 : vector<52x324xf32> to vector<1x52x324xf32>
    tpu.vector_store %arg7[%c0_79, %c0_80, %c0_81], %69 {strides = array<i32>} : memref<1x52x324xf32, #tpu.memory_space<vmem>>, vector<1x52x324xf32>,
    return
  }
  func.func @transform_0(%arg0: i32) -> (i32, i32, i32) {
    %c0_i32 = arith.constant 0 : i32
    %c0_i32_0 = arith.constant 0 : i32
    %c0_i32_1 = arith.constant 0 : i32
    return %arg0, %c0_i32, %c0_i32_0 : i32, i32, i32
  }
  func.func @transform_1(%arg0: i32) -> (i32, i32) {
    %c0_i32 = arith.constant 0 : i32
    %c0_i32_0 = arith.constant 0 : i32
    %c0_i32_1 = arith.constant 0 : i32
    return %c0_i32, %c0_i32_0 : i32, i32
  }
  func.func @transform_2(%arg0: i32) -> (i32, i32) {
    %c0_i32 = arith.constant 0 : i32
    %c0_i32_0 = arith.constant 0 : i32
    %c0_i32_1 = arith.constant 0 : i32
    return %c0_i32, %c0_i32_0 : i32, i32
  }
  func.func @transform_3(%arg0: i32) -> (i32, i32) {
    %c0_i32 = arith.constant 0 : i32
    %c0_i32_0 = arith.constant 0 : i32
    %c0_i32_1 = arith.constant 0 : i32
    return %c0_i32, %c0_i32_0 : i32, i32
  }
  func.func @transform_4(%arg0: i32) -> (i32, i32) {
    %c0_i32 = arith.constant 0 : i32
    %c0_i32_0 = arith.constant 0 : i32
    %c0_i32_1 = arith.constant 0 : i32
    return %c0_i32, %c0_i32_0 : i32, i32
  }
  func.func @transform_5(%arg0: i32) -> (i32, i32) {
    %c0_i32 = arith.constant 0 : i32
    %c0_i32_0 = arith.constant 0 : i32
    %c0_i32_1 = arith.constant 0 : i32
    return %c0_i32, %c0_i32_0 : i32, i32
  }
  func.func @transform_6(%arg0: i32) -> (i32, i32, i32) {
    %c0_i32 = arith.constant 0 : i32
    %c0_i32_0 = arith.constant 0 : i32
    %c0_i32_1 = arith.constant 0 : i32
    return %arg0, %c0_i32, %c0_i32_0 : i32, i32, i32
  }
}

</mosaic_0001>

<bundles_post_ra>
// kernel: dense_block_forward.1
= control target key start
LH: loop header
LB: loop body
LE: loop exit
PB: predicated region body
PF: predicated region fallthrough
CT: control target
= control target key end

     0   :  { %s2556_s21 = smov 0   ;;  %s4101_s0 = inlined_call_operand.vmem [shape: f32[2,4,324], index: 0, kind: input, shape index: {}]   ;;  %s4102_s1 = inlined_call_operand.vmem [shape: f32[16,36], index: 1, kind: input, shape index: {}]   ;;  %s4103_s2 = inlined_call_operand.vmem [shape: f32[16,180], index: 2, kind: input, shape index: {}]   ;;  %s4104_s3 = inlined_call_operand.vmem [shape: f32[16,324], index: 3, kind: input, shape index: {}]   ;;  %s4105_s4 = inlined_call_operand.vmem [shape: f32[16,3], index: 4, kind: input, shape index: {}]   ;;  %s4106_s5 = inlined_call_operand.vmem [shape: f32[1,324], index: 5, kind: input, shape index: {}]   ;;  %s4107_s6 = inlined_call_operand.vmem [shape: f32[2,52,324], index: 6, kind: output, shape index: {}]  }
   0x1 LB: > { %s2342_s22 = sadd.s32 4294967295, %s2506_s21   ;;  %p2346_p0 = scmp.ge.s32.totalorder %s2506_s21, 1  ;;  %s2506_s21 = sphi %s2556_s21, %s16_s21  }
   0x2   : > { %p212_p1 = scmp.lt.s32.totalorder %s2506_s21, 3 }
   0x4   : > { %p213_p2 = pnand %p2346_p0, %p212_p1 }
   0x6   : > { %216 = sbr.rel (%p213_p2) target bundleno = 1949 (0x79d), region = 44 }
   0xb   : > { %p2564_p3 = scmp.lt.s32.totalorder %s2342_s22, 1  ;;  %v4109_v0 = vmov 0.0   ;;  %vm254_vm0 = vcmask 867328   ;;  %s2509_s28 = smov 19   ;;  %vm291_vm1 = vcmask 1043608   ;;  %vm285_vm2 = vcmask 154624  }
   0xc   : > { %252 = vst [vmem:[#allocation2] sm:$0xff] %v4109_v0  ;;  %253 = vst [vmem:[#allocation2 + $0x8] sm:$0xff] %v4109_v0  ;;  %503 = vmatprep.mubr.f32.mxu0 %v4109_v0  ;;  %vm294_vm3 = vcmask 707584   ;;  %s2510_s29 = smov 90   ;;  %s2511_s30 = smov 92   ;;  %v2644_v15 = vld [vmem:[%s4102_s1] sm:$0xff] }
   0xd   : > { %256 = vst [vmem:[#allocation2 + $0x18] sm:$0xff] %v4109_v0  ;;  %259 = vst [vmem:[#allocation2 + $0x30] sm:$0xff] %v4109_v0  ;;  %s4242_s22 = smov (!%p2564_p3, %s2342_s22), 1  ;;  %s2512_s7 = smov 91   ;;  %vm426_vm4 = vcmask 293888   ;;  %v2518_v16 = vmov 0  }
   0xe   : > { %260 = vst [vmem:[#allocation2 + $0x38] sm:$0xff] %v4109_v0  ;;  %262 = vst [vmem:[#allocation2 + $0x48] sm:$0xff] %v4109_v0  ;;  %s2462_s24 = smul.u32 12, %s4242_s22  ;;  %s2513_s8 = smov 109   ;;  %2438 = vmatprep.mubr.msk.f32.mxu1 %vm426_vm4, %v2644_v15  ;;  %2486 = vset.pattern.permute.xlu0 %v2518_v16  ;;  %v2657_v17 = vld [vmem:[%s4105_s4 + $0x8] sm:$0xff]  ;;  %v2662_v18 = vld [vmem:[%s4105_s4] sm:$0xff] }
   0xf   : > { %265 = vst [vmem:[#allocation2 + $0x60] sm:$0xff] %v4109_v0  ;;  %266 = vst [vmem:[#allocation2 + $0x68] sm:$0xff] %v4109_v0  ;;  %s2514_s9 = smov 108   ;;  %s2515_s10 = smov 126   ;;  %2485 = vset.pattern.permute.xlu1 %v2518_v16  ;;  %vm399_vm5 = vcmask 1043456   ;;  %vm396_vm6 = vcmask 736256  }
  0x10   : > { %268 = vst [vmem:[#allocation2 + $0x78] sm:$0xff] %v4109_v0  ;;  %271 = vst [vmem:[#allocation2 + $0x90] sm:$0xff] %v4109_v0  ;;  %s246_s27 = scalar_lea.vmem %s4101_s0, %s2462_s24  ;;  %s2516_s11 = smov 110   ;;  %vm372_vm7 = vcmask 752640   ;;  %vm384_vm8 = vcmask 744448   ;;  %vm360_vm9 = vcmask 883712  }
  0x11   : > { %272 = vst [vmem:[#allocation2 + $0x98] sm:$0xff] %v4109_v0  ;;  %255 = vst.msk [vmem:[#allocation2 + $0x10] sm:$0xff] %vm254_vm0, %v4109_v0  ;;  %v274_v1 = vld [vmem:[%s246_s27] sm:$0xff]  ;;  %v275_v2 = vld [vmem:[%s246_s27 + $0x8] sm:$0xf]  ;;  %s2517_s14 = smov 127  }
  0x12   : > { %258 = vst.msk [vmem:[#allocation2 + $0x28] sm:$0xff] %vm254_vm0, %v4109_v0  ;;  %261 = vst.msk [vmem:[#allocation2 + $0x40] sm:$0xff] %vm254_vm0, %v4109_v0  ;;  %279 = vrot.lane.b32.xlu0 %v274_v1, %s2509_s28  ;;  %v278_v3 = vcombine.high %v274_v1, %v274_v1  ;;  %283 = vrot.lane.b32.xlu1 %v275_v2, %s2509_s28  ;;  %vm348_vm10 = vcmask 891904   ;;  %vm336_vm11 = vcmask 900096   ;;  %vm324_vm12 = vcmask 1031168  }
  0x13   : > { %264 = vst.msk [vmem:[#allocation2 + $0x58] sm:$0xff] %vm254_vm0, %v4109_v0  ;;  %267 = vst.msk [vmem:[#allocation2 + $0x70] sm:$0xff] %vm254_vm0, %v4109_v0  ;;  %vm312_vm13 = vcmask 1039360   ;;  %vm667_vm14 = vcmask 1047708   ;;  %vm670_vm15 = vcmask 711684  }
  0x14   : > { %270 = vst.msk [vmem:[#allocation2 + $0x88] sm:$0xff] %vm254_vm0, %v4109_v0  ;;  %273 = vst.msk [vmem:[#allocation2 + $0xa0] sm:$0xff] %vm254_vm0, %v4109_v0  ;;  %vm672_vm0 = vcmask 1047704  }
  0x16   : > { %281 = vrot.lane.b32.xlu0 %v278_v3, %s2509_s28 }
  0x84   : > { %v280_v4 = vpop.permute.xlu0 %279  ;;  %v284_v5 = vpop.permute.xlu1 %283 }
  0x85   : > { %292 = vst.msk [vmem:[#allocation2] sm:$0xf] %vm291_vm1, %v280_v4 }
  0x88   : > { %v282_v6 = vpop.permute.xlu0 %281 }
  0x89   : > { %v286_v7 = vsel %vm285_vm2, %v280_v4, %v282_v6  ;;  %v287_v8 = vsel %vm285_vm2, %v282_v6, %v284_v5  ;;  %v413_v6 = vld [vmem:[%s4102_s1 + $0x8] sm:$0xff] }
  0x8a   : > { %293 = vst [vmem:[#allocation2 + $0x8] sm:$0xf] %v286_v7  ;;  %295 = vst.msk [vmem:[#allocation2 + $0x10] sm:$0xf] %vm294_vm3, %v287_v8 }
  0x8c   : > { %v2602_v9 = vld [vmem:[#allocation2] sm:$0xf] }
  0x8d   : > { %390 = vrot.lane.b32.xlu1 %v2602_v9, %s2510_s29  ;;  %366 = vrot.lane.b32.xlu0 %v2602_v9, %s2511_s30  ;;  %v303_v10 = vrot.slane %v2602_v9, 4 }
  0x91   : > { %378 = vrot.lane.b32.xlu1 %v303_v10, %s2512_s7  ;;  %342 = vrot.lane.b32.xlu0 %v2602_v9, %s2513_s8  ;;  %v2615_v11 = vld [vmem:[#allocation2 + $0x10] sm:$0xf]  ;;  %v2620_v12 = vld [vmem:[#allocation2 + $0x8] sm:$0xf] }
  0x92   : > { %v305_v13 = vrot.slane %v2615_v11, 4  ;;  %v304_v14 = vrot.slane %v2620_v12, 4 }
  0x95   : > { %354 = vrot.lane.b32.xlu1 %v303_v10, %s2514_s9  ;;  %318 = vrot.lane.b32.xlu0 %v2602_v9, %s2515_s10 }
  0x99   : > { %330 = vrot.lane.b32.xlu1 %v303_v10, %s2516_s11  ;;  %394 = vrot.lane.b32.xlu0 %v2615_v11, %s2510_s29 }
  0x9d   : > { %370 = vrot.lane.b32.xlu0 %v2615_v11, %s2511_s30  ;;  %392 = vrot.lane.b32.xlu1 %v2620_v12, %s2510_s29 }
  0xa1   : > { %344 = vrot.lane.b32.xlu0 %v2620_v12, %s2513_s8  ;;  %368 = vrot.lane.b32.xlu1 %v2620_v12, %s2511_s30 }
  0xa5   : > { %320 = vrot.lane.b32.xlu0 %v2620_v12, %s2515_s10  ;;  %346 = vrot.lane.b32.xlu1 %v2615_v11, %s2513_s8 }
  0xa9   : > { %382 = vrot.lane.b32.xlu0 %v305_v13, %s2512_s7  ;;  %322 = vrot.lane.b32.xlu1 %v2615_v11, %s2515_s10 }
  0xad   : > { %356 = vrot.lane.b32.xlu0 %v304_v14, %s2514_s9  ;;  %380 = vrot.lane.b32.xlu1 %v304_v14, %s2512_s7 }
  0xb1   : > { %332 = vrot.lane.b32.xlu0 %v304_v14, %s2516_s11  ;;  %358 = vrot.lane.b32.xlu1 %v305_v13, %s2514_s9 }
  0xb5   : > { %308 = vrot.lane.b32.xlu0 %v304_v14, %s2517_s14  ;;  %334 = vrot.lane.b32.xlu1 %v305_v13, %s2516_s11 }
  0xb9   : > { %306 = vrot.lane.b32.xlu0 %v303_v10, %s2517_s14  ;;  %310 = vrot.lane.b32.xlu1 %v305_v13, %s2517_s14  ;;  %v598_v10 = vlaneseq }
  0xbd   : > { %423 = vperm.xlu0 %2486, %v2657_v17   ;;  %418 = vperm.xlu1 %2485, %v2662_v18  }
  0xff   : > { %v391_v19 = vpop.permute.xlu1 %390  ;;  %v367_v20 = vpop.permute.xlu0 %366 }
 0x103   : > { %v379_v21 = vpop.permute.xlu1 %378  ;;  %v343_v22 = vpop.permute.xlu0 %342 }
 0x107   : > { %v355_v23 = vpop.permute.xlu1 %354  ;;  %v319_v24 = vpop.permute.xlu0 %318 }
 0x10b   : > { %v331_v25 = vpop.permute.xlu1 %330  ;;  %v395_v26 = vpop.permute.xlu0 %394 }
 0x10c   : > { %2428 = vmatprep.subr.msk.mxu1 %vm399_vm5, %v395_v26 }
 0x10d   : > { %2429 = vmatpush3.msk.msra.mxu1 %vm399_vm5, %v395_v26 }
 0x10f   : > { %v393_v27 = vpop.permute.xlu1 %392  ;;  %v371_v28 = vpop.permute.xlu0 %370 }
 0x110   : > { %v398_v29 = vsel %vm396_vm6, %v393_v27, %v395_v26  ;;  %v397_v30 = vsel %vm396_vm6, %v391_v19, %v393_v27 }
 0x111   : > { %2349 = vmatprep.subr.msk.mxu0 %vm399_vm5, %v398_v29 }
 0x112   : > { %2350 = vmatpush1.msk.msra.mxu0 %vm399_vm5, %v397_v30 }
 0x113   : > { %v369_v31 = vpop.permute.xlu1 %368  ;;  %v345_v32 = vpop.permute.xlu0 %344 }
 0x114   : > { %v373_v40 = vsel %vm372_vm7, %v367_v20, %v369_v31  ;;  %v374_v41 = vsel %vm372_vm7, %v369_v31, %v371_v28  ;;  %v349_v52 = vsel %vm348_vm10, %v343_v22, %v345_v32 }
 0x117   : > { %v347_v33 = vpop.permute.xlu1 %346  ;;  %v321_v34 = vpop.permute.xlu0 %320 }
 0x118   : > { %v350_v49 = vsel %vm348_vm10, %v345_v32, %v347_v33  ;;  %v325_v61 = vsel %vm324_vm12, %v319_v24, %v321_v34 }
 0x11b   : > { %v323_v35 = vpop.permute.xlu1 %322  ;;  %v383_v36 = vpop.permute.xlu0 %382 }
 0x11c   : > { %v411_v37 = vsel %vm399_vm5, %v371_v28, %v383_v36  ;;  %v326_v58 = vsel %vm324_vm12, %v321_v34, %v323_v35 }
 0x11d   : > { %2430 = vmatprep.subr.mxu1 %v411_v37 }
 0x11e   : > { %2431 = vmatpush3.msra.mxu1 %v411_v37 }
 0x11f   : > { %v381_v38 = vpop.permute.xlu1 %380  ;;  %v357_v39 = vpop.permute.xlu0 %356 }
 0x120   : > { %v385_v42 = vsel %vm384_vm8, %v379_v21, %v381_v38  ;;  %v386_v43 = vsel %vm384_vm8, %v381_v38, %v383_v36  ;;  %v361_v46 = vsel %vm360_vm9, %v355_v23, %v357_v39 }
 0x121   : > { %v410_v44 = vsel %vm399_vm5, %v374_v41, %v386_v43  ;;  %v409_v45 = vsel %vm399_vm5, %v373_v40, %v385_v42  ;;  %v406_v54 = vsel %vm399_vm5, %v349_v52, %v361_v46 }
 0x122   : > { %463 = vmatprep.subr.mxu0 %v410_v44 }
 0x123   : > { %v359_v47 = vpop.permute.xlu1 %358  ;;  %464 = vmatpush1.msra.mxu0 %v409_v45  ;;  %v333_v48 = vpop.permute.xlu0 %332 }
 0x124   : > { %v362_v50 = vsel %vm360_vm9, %v357_v39, %v359_v47  ;;  %v408_v51 = vsel %vm399_vm5, %v347_v33, %v359_v47  ;;  %v337_v55 = vsel %vm336_vm11, %v331_v25, %v333_v48 }
 0x125   : > { %2432 = vmatprep.subr.mxu1 %v408_v51  ;;  %v407_v53 = vsel %vm399_vm5, %v350_v49, %v362_v50  ;;  %v403_v63 = vsel %vm399_vm5, %v325_v61, %v337_v55 }
 0x126   : > { %465 = vmatprep.subr.mxu0 %v407_v53  ;;  %2433 = vmatpush3.msra.mxu1 %v408_v51 }
 0x127   : > { %v335_v56 = vpop.permute.xlu1 %334  ;;  %466 = vmatpush1.msra.mxu0 %v406_v54  ;;  %v309_v57 = vpop.permute.xlu0 %308 }
 0x128   : > { %v338_v59 = vsel %vm336_vm11, %v333_v48, %v335_v56  ;;  %v405_v60 = vsel %vm399_vm5, %v323_v35, %v335_v56 }
 0x129   : > { %2434 = vmatprep.subr.mxu1 %v405_v60  ;;  %v404_v62 = vsel %vm399_vm5, %v326_v58, %v338_v59 }
 0x12a   : > { %467 = vmatprep.subr.mxu0 %v404_v62  ;;  %2435 = vmatpush3.msra.mxu1 %v405_v60 }
 0x12b   : > { %v311_v1 = vpop.permute.xlu1 %310  ;;  %468 = vmatpush1.msra.mxu0 %v403_v63  ;;  %v307_v2 = vpop.permute.xlu0 %306 }
 0x12c   : > { %v314_v3 = vsel %vm312_vm13, %v309_v57, %v311_v1  ;;  %v313_v4 = vsel %vm312_vm13, %v307_v2, %v309_v57  ;;  %v402_v5 = vsel %vm399_vm5, %v2615_v11, %v311_v1  ;;  %v599_v11 = vshrl.u32 %v598_v10, 7 }
 0x12d   : > { %2436 = vmatprep.subr.mxu1 %v402_v5  ;;  %v401_v7 = vsel %vm399_vm5, %v2620_v12, %v314_v3  ;;  %v400_v8 = vsel %vm399_vm5, %v2602_v9, %v313_v4  ;;  %v296_v9 = vld [vmem:[%s4106_s5] sm:$0x7] }
 0x12e   : > { %469 = vmatprep.subr.mxu0 %v401_v7  ;;  %2437 = vmatpush3.msra.mxu1 %v402_v5  ;;  %v608_v12 = vsub.s32 2, %v599_v11  ;;  %v600_v14 = vsub.s32 0, %v599_v11  ;;  %v604_v20 = vsub.s32 1, %v599_v11  ;;  %v2519_v11 = vmov 1  }
 0x12f   : > { %470 = vmatpush1.msra.mxu0 %v400_v8  ;;  %2439 = vmatmul.mubr.msk.f32.vlgmr.msra.gmra.mxu1 %vm426_vm4, %v413_v6 }
 0x130   : > { %2351 = vmatmul.mubr.msk.f32.vlgmr.msra.gmra.mxu0 %vm426_vm4, %v2644_v15  ;;  %1092 = vmatprep.subr.mxu1 %v4109_v0  ;;  %v2713_v22 = vrot.slane %v296_v9, %v608_v12  ;;  %v2715_v24 = vrot.slane %v296_v9, %v600_v14  ;;  %v2717_v31 = vrot.slane %v296_v9, %v604_v20 }
 0x131   : > { %509 = vmatprep.mubr.f32.mxu0 %v4109_v0  ;;  %2487 = vset.pattern.permute.xlu1 %v2519_v11 }
 0x132   : > { %4155 = vst [vmem:[#allocation3_spill] sm:$0xff] %v2713_v22  ;;  %4156 = vst [vmem:[#allocation4_spill] sm:$0xff] %v2715_v24  ;;  %2488 = vset.pattern.permute.xlu0 %v2519_v11 }
 0x133   : > { %4157 = vst [vmem:[#allocation5_spill] sm:$0xff] %v2717_v31 }
 0x134   : > { %2352 = vmatmul.mubr.msk.f32.gmra.mxu0 %vm426_vm4, %v413_v6  ;;  %vm4108_vm4 = vcmask 711680  }
 0x138   : > { %v424_v13 = vpop.permute.xlu0 %423  ;;  %v419_v16 = vpop.permute.xlu1 %418 }
 0x1ef   : > { %v2440_v19 = vpop.f32.mrf.mxu1 }
 0x1f0   : > { %v588_v21 = vadd.f32 %v2440_v19, %v424_v13  ;;  %v505_v15 = vpop.f32.mrf.mxu0 }
 0x1f1   : > { %v506_v23 = vadd.f32 %v505_v15, %v419_v16  ;;  %v582_v25 = vpop.f32.mrf.mxu1 }
 0x1f2   : > { %v596_v26 = vmax.f32 %v588_v21, 0.0  ;;  %v583_v27 = vadd.f32 %v582_v25, %v419_v16  ;;  %v507_v28 = vpop.f32.mrf.mxu0 }
 0x1f3   : > { %v591_v29 = vmax.f32 %v506_v23, 0.0  ;;  %v508_v30 = vadd.f32 %v507_v28, %v419_v16 }
 0x1f4   : > { %v593_v32 = vmax.f32 %v583_v27, 0.0  ;;  %v511_v33 = vpop.f32.mrf.mxu0  ;;  %v618_v34 = vmul.f32 %v2713_v22, %v596_v26 }
 0x1f5   : > { %v613_v35 = vmul.f32 %v2715_v24, %v591_v29  ;;  %v592_v36 = vmax.f32 %v508_v30, 0.0  ;;  %v512_v37 = vadd.f32 %v511_v33, %v424_v13 }
 0x1f6   : > { %v615_v38 = vmul.f32 %v2713_v22, %v593_v32  ;;  %v513_v39 = vpop.f32.mrf.mxu0  ;;  %v632_v40 = vrot.slane %v618_v34, 4 }
 0x1f7   : > { %v625_v41 = vrot.slane %v613_v35, 4  ;;  %v614_v42 = vmul.f32 %v2717_v31, %v592_v36  ;;  %v594_v43 = vmax.f32 %v512_v37, 0.0  ;;  %v514_v44 = vadd.f32 %v513_v39, %v424_v13 }
 0x1f8   : > { %650 = vrot.lane.b32.xlu1 %v632_v40, %s2509_s28  ;;  %v627_v47 = vrot.slane %v615_v38, 4 }
 0x1f9   : > { %v626_v45 = vrot.slane %v614_v42, 4  ;;  %634 = vrot.lane.b32.xlu0 %v625_v41, %s2509_s28  ;;  %v616_v46 = vmul.f32 %v2715_v24, %v594_v43  ;;  %v595_v48 = vmax.f32 %v514_v44, 0.0  ;;  %v987_v44 = vld [vmem:[%s4103_s2 + $0x8] sm:$0xff] }
 0x1fa   : > { %v633_v51 = vsel %vm399_vm5, %v627_v47, %v632_v40 }
 0x1fb   : > { %v628_v49 = vrot.slane %v616_v46, 4  ;;  %v617_v50 = vmul.f32 %v2717_v31, %v595_v48 }
 0x1fc   : > { %636 = vrot.lane.b32.xlu1 %v626_v45, %s2509_s28 }
 0x1fd   : > { %638 = vrot.lane.b32.xlu0 %v627_v47, %s2509_s28  ;;  %v630_v52 = vrot.slane %v617_v50, 4  ;;  %v629_v53 = vsel %vm399_vm5, %v625_v41, %v628_v49 }
 0x1ff   : > { %v631_v54 = vsel %vm399_vm5, %v626_v45, %v630_v52 }
 0x200   : > { %646 = vrot.lane.b32.xlu1 %v628_v49, %s2509_s28 }
 0x201   : > { %644 = vrot.lane.b32.xlu0 %v633_v51, %s2509_s28 }
 0x204   : > { %640 = vrot.lane.b32.xlu1 %v629_v53, %s2509_s28 }
 0x205   : > { %648 = vrot.lane.b32.xlu0 %v630_v52, %s2509_s28 }
 0x208   : > { %642 = vrot.lane.b32.xlu1 %v631_v54, %s2509_s28 }
 0x26a   : > { %v651_v55 = vpop.permute.xlu1 %650 }
 0x26b   : > { %v635_v56 = vpop.permute.xlu0 %634 }
 0x26c   : > { %668 = vst.msk [vmem:[#allocation2] sm:$0xf0] %vm667_vm14, %v635_v56 }
 0x26e   : > { %v637_v57 = vpop.permute.xlu1 %636 }
 0x26f   : > { %v652_v58 = vsel %vm285_vm2, %v635_v56, %v637_v57  ;;  %v639_v59 = vpop.permute.xlu0 %638 }
 0x270   : > { %669 = vst [vmem:[#allocation2 + $0x8] sm:$0xf0] %v652_v58  ;;  %v653_v60 = vsel %vm285_vm2, %v637_v57, %v639_v59 }
 0x271   : > { %671 = vst.msk [vmem:[#allocation2 + $0x10] sm:$0xf0] %vm670_vm15, %v653_v60 }
 0x272   : > { %v647_v61 = vpop.permute.xlu1 %646 }
 0x273   : > { %677 = vst.msk [vmem:[#allocation2 + $0x30] sm:$0xf] %vm291_vm1, %v647_v61  ;;  %v645_v62 = vpop.permute.xlu0 %644  ;;  %v2742_v63 = vld [vmem:[#allocation2] sm:$0xff] }
 0x274   : > { %878 = vrot.lane.b32.xlu1 %v2742_v63, %s2511_s30  ;;  %v2747_v1 = vrot.slane %v2742_v63, 4 }
 0x276   : > { %4158 = vst [vmem:[#allocation6_spill] sm:$0xff] %v2747_v1  ;;  %v641_v2 = vpop.permute.xlu1 %640  ;;  %713 = vrot.lane.b32.xlu0 %v2747_v1, %s2517_s14 }
 0x277   : > { %673 = vst.msk [vmem:[#allocation2 + $0x18] sm:$0xff] %vm672_vm0, %v641_v2  ;;  %v649_v3 = vpop.permute.xlu0 %648  ;;  %v2785_v13 = vld [vmem:[#allocation2 + $0x8] sm:$0xff] }
 0x278   : > { %v656_v4 = vsel %vm285_vm2, %v647_v61, %v649_v3  ;;  %v657_v5 = vsel %vm285_vm2, %v649_v3, %v651_v55  ;;  %812 = vrot.lane.b32.xlu1 %v2742_v63, %s2513_s8  ;;  %v2756_v6 = vld [vmem:[#allocation2 + $0x10] sm:$0xff]  ;;  %v2813_v16 = vrot.slane %v2785_v13, 4 }
 0x279   : > { %678 = vst [vmem:[#allocation2 + $0x38] sm:$0xf] %v656_v4  ;;  %679 = vst.msk [vmem:[#allocation2 + $0x40] sm:$0xf] %vm294_vm3, %v657_v5  ;;  %v2794_v9 = vrot.slane %v2756_v6, 4 }
 0x27a   : > { %v643_v7 = vpop.permute.xlu1 %642  ;;  %882 = vrot.lane.b32.xlu0 %v2756_v6, %s2511_s30  ;;  %v2781_v12 = vld [vmem:[#allocation2 + $0x30] sm:$0xf]  ;;  %4159 = vst [vmem:[#allocation7_spill] sm:$0xff] %v2813_v16 }
 0x27b   : > { %v2762_v8 = vsel %vm285_vm2, %v641_v2, %v643_v7  ;;  %v655_v10 = vsel %vm285_vm2, %v643_v7, %v645_v62  ;;  %v707_v15 = vrot.slane %v2781_v12, 4 }
 0x27c   : > { %674 = vst [vmem:[#allocation2 + $0x20] sm:$0xff] %v2762_v8  ;;  %676 = vst.msk [vmem:[#allocation2 + $0x28] sm:$0xff] %vm4108_vm4, %v655_v10  ;;  %746 = vrot.lane.b32.xlu1 %v2742_v63, %s2515_s10  ;;  %v2878_v28 = vrot.slane %v2762_v8, 4  ;;  %vm1002_vm4 = vcmask 424960  }
 0x27d   : > { %2361 = vmatprep.mubr.msk.f32.mxu1 %vm1002_vm4, %v987_v44  ;;  %2358 = vmatprep.mubr.msk.f32.mxu0 %vm1002_vm4, %v987_v44 }
 0x27e   : > { %816 = vrot.lane.b32.xlu0 %v2756_v6, %s2513_s8  ;;  %v2800_v14 = vld [vmem:[#allocation2 + $0x18] sm:$0xff]  ;;  %4162 = vst [vmem:[#allocation10_spill] sm:$0xff] %v2878_v28  ;;  %v2902_v35 = vsel %vm399_vm5, %v2813_v16, %v2878_v28 }
 0x27f   : > { %v2838_v21 = vrot.slane %v2800_v14, 4 }
 0x280   : > { %944 = vrot.lane.b32.xlu1 %v2742_v63, %s2510_s29  ;;  %v2825_v19 = vld [vmem:[#allocation2 + $0x40] sm:$0xf]  ;;  %v2829_v20 = vld [vmem:[#allocation2 + $0x38] sm:$0xf] }
 0x281   : > { %4160 = vst [vmem:[#allocation8_spill] sm:$0xff] %v2838_v21  ;;  %v708_v23 = vsel %vm399_vm5, %v2838_v21, %v707_v15  ;;  %v2855_v25 = vsel %vm399_vm5, %v2747_v1, %v2838_v21  ;;  %v709_v27 = vrot.slane %v2829_v20, 4  ;;  %v711_v32 = vrot.slane %v2825_v19, 4 }
 0x282   : > { %750 = vrot.lane.b32.xlu0 %v2756_v6, %s2515_s10  ;;  %4161 = vst [vmem:[#allocation9_spill] sm:$0xff] %v2855_v25  ;;  %v4164_v21 = vmov 0.0  }
 0x283   : > { %v2860_v26 = vld [vmem:[#allocation2 + $0x28] sm:$0xff]  ;;  %v710_v30 = vsel %vm399_vm5, %v2878_v28, %v709_v27 }
 0x284   : > { %845 = vrot.lane.b32.xlu1 %v2747_v1, %s2514_s9  ;;  %v2881_v29 = vrot.slane %v2860_v26, 4 }
 0x286   : > { %948 = vrot.lane.b32.xlu0 %v2756_v6, %s2510_s29  ;;  %4163 = vst [vmem:[#allocation11_spill] sm:$0xff] %v2881_v29  ;;  %v712_v33 = vsel %vm399_vm5, %v2881_v29, %v711_v32  ;;  %v2895_v34 = vsel %vm399_vm5, %v2794_v9, %v2881_v29 }
 0x288   : > { %779 = vrot.lane.b32.xlu1 %v2747_v1, %s2516_s11 }
 0x28a   : > { %824 = vrot.lane.b32.xlu0 %v2781_v12, %s2513_s8 }
 0x28c   : > { %880 = vrot.lane.b32.xlu1 %v2785_v13, %s2511_s30 }
 0x28e   : > { %758 = vrot.lane.b32.xlu0 %v2781_v12, %s2515_s10 }
 0x290   : > { %814 = vrot.lane.b32.xlu1 %v2785_v13, %s2513_s8 }
 0x292   : > { %849 = vrot.lane.b32.xlu0 %v2794_v9, %s2514_s9 }
 0x294   : > { %748 = vrot.lane.b32.xlu1 %v2785_v13, %s2515_s10 }
 0x296   : > { %818 = vrot.lane.b32.xlu0 %v2800_v14, %s2513_s8 }
 0x298   : > { %946 = vrot.lane.b32.xlu1 %v2785_v13, %s2510_s29 }
 0x29a   : > { %783 = vrot.lane.b32.xlu0 %v2794_v9, %s2516_s11 }
 0x29c   : > { %956 = vrot.lane.b32.xlu1 %v2781_v12, %s2510_s29 }
 0x29e   : > { %752 = vrot.lane.b32.xlu0 %v2800_v14, %s2515_s10 }
 0x2a0   : > { %847 = vrot.lane.b32.xlu1 %v2813_v16, %s2514_s9 }
 0x2a2   : > { %717 = vrot.lane.b32.xlu0 %v2794_v9, %s2517_s14 }
 0x2a4   : > { %781 = vrot.lane.b32.xlu1 %v2813_v16, %s2516_s11 }
 0x2a6   : > { %950 = vrot.lane.b32.xlu0 %v2800_v14, %s2510_s29 }
 0x2a8   : > { %715 = vrot.lane.b32.xlu1 %v2813_v16, %s2517_s14 }
 0x2aa   : > { %828 = vrot.lane.b32.xlu0 %v2825_v19, %s2513_s8 }
 0x2ac   : > { %826 = vrot.lane.b32.xlu1 %v2829_v20, %s2513_s8 }
 0x2ae   : > { %762 = vrot.lane.b32.xlu0 %v2825_v19, %s2515_s10 }
 0x2b0   : > { %760 = vrot.lane.b32.xlu1 %v2829_v20, %s2515_s10 }
 0x2b2   : > { %960 = vrot.lane.b32.xlu0 %v2825_v19, %s2510_s29 }
 0x2b4   : > { %958 = vrot.lane.b32.xlu1 %v2829_v20, %s2510_s29 }
 0x2b6   : > { %857 = vrot.lane.b32.xlu0 %v708_v23, %s2514_s9 }
 0x2b8   : > { %892 = vrot.lane.b32.xlu1 %v2829_v20, %s2511_s30 }
 0x2ba   : > { %820 = vrot.lane.b32.xlu0 %v2762_v8, %s2513_s8 }
 0x2bc   : > { %851 = vrot.lane.b32.xlu1 %v2855_v25, %s2514_s9 }
 0x2be   : > { %791 = vrot.lane.b32.xlu0 %v708_v23, %s2516_s11 }
 0x2c0   : > { %822 = vrot.lane.b32.xlu1 %v2860_v26, %s2513_s8 }
 0x2c2   : > { %754 = vrot.lane.b32.xlu0 %v2762_v8, %s2515_s10 }
 0x2c4   : > { %785 = vrot.lane.b32.xlu1 %v2855_v25, %s2516_s11 }
 0x2c6   : > { %725 = vrot.lane.b32.xlu0 %v708_v23, %s2517_s14 }
 0x2c8   : > { %756 = vrot.lane.b32.xlu1 %v2860_v26, %s2515_s10 }
 0x2ca   : > { %952 = vrot.lane.b32.xlu0 %v2762_v8, %s2510_s29 }
 0x2cc   : > { %719 = vrot.lane.b32.xlu1 %v2855_v25, %s2517_s14 }
 0x2ce   : > { %923 = vrot.lane.b32.xlu0 %v708_v23, %s2512_s7 }
 0x2d0   : > { %954 = vrot.lane.b32.xlu1 %v2860_v26, %s2510_s29 }
 0x2d2   : > { %859 = vrot.lane.b32.xlu0 %v710_v30, %s2514_s9 }
 0x2d4   : > { %861 = vrot.lane.b32.xlu1 %v712_v33, %s2514_s9 }
 0x2d6   : > { %855 = vrot.lane.b32.xlu0 %v2895_v34, %s2514_s9 }
 0x2d8   : > { %853 = vrot.lane.b32.xlu1 %v2902_v35, %s2514_s9 }
 0x2da   : > { %894 = vrot.lane.b32.xlu0 %v2825_v19, %s2511_s30 }
 0x2dc   : > { %795 = vrot.lane.b32.xlu1 %v712_v33, %s2516_s11 }
 0x2de   : > { %793 = vrot.lane.b32.xlu0 %v710_v30, %s2516_s11 }
 0x2e0   : > { %787 = vrot.lane.b32.xlu1 %v2902_v35, %s2516_s11 }
 0x2e2   : > { %789 = vrot.lane.b32.xlu0 %v2895_v34, %s2516_s11 }
 0x2e4   : > { %913 = vrot.lane.b32.xlu1 %v2813_v16, %s2512_s7 }
 0x2e6   : > { %v879_v36 = vpop.permute.xlu1 %878  ;;  %727 = vrot.lane.b32.xlu0 %v710_v30, %s2517_s14 }
 0x2e8   : > { %729 = vrot.lane.b32.xlu1 %v712_v33, %s2517_s14  ;;  %v2918_v37 = vpop.permute.xlu0 %713 }
 0x2ea   : > { %v2920_v38 = vpop.permute.xlu1 %812  ;;  %723 = vrot.lane.b32.xlu0 %v2895_v34, %s2517_s14 }
 0x2ec   : > { %721 = vrot.lane.b32.xlu1 %v2902_v35, %s2517_s14  ;;  %v883_v39 = vpop.permute.xlu0 %882 }
 0x2ed   : > { %1093 = vmatpush1.msra.mxu1 %v883_v39 }
 0x2ee   : > { %v2926_v40 = vpop.permute.xlu1 %746  ;;  %915 = vrot.lane.b32.xlu0 %v2794_v9, %s2512_s7  ;;  %1094 = vmatprep.subr.mxu1 %v4109_v0 }
 0x2f0   : > { %917 = vrot.lane.b32.xlu1 %v2855_v25, %s2512_s7  ;;  %v2933_v41 = vpop.permute.xlu0 %816 }
 0x2f2   : > { %v2935_v42 = vpop.permute.xlu1 %944  ;;  %890 = vrot.lane.b32.xlu0 %v2781_v12, %s2511_s30 }
 0x2f4   : > { %911 = vrot.lane.b32.xlu1 %v2747_v1, %s2512_s7  ;;  %v2941_v43 = vpop.permute.xlu0 %750 }
 0x2f6   : > { %v2946_v45 = vpop.permute.xlu1 %845  ;;  %925 = vrot.lane.b32.xlu0 %v710_v30, %s2512_s7 }
 0x2f8   : > { %927 = vrot.lane.b32.xlu1 %v712_v33, %s2512_s7  ;;  %v2952_v46 = vpop.permute.xlu0 %948 }
 0x2fa   : > { %v2954_v47 = vpop.permute.xlu1 %779  ;;  %921 = vrot.lane.b32.xlu0 %v2895_v34, %s2512_s7 }
 0x2fc   : > { %919 = vrot.lane.b32.xlu1 %v2902_v35, %s2512_s7  ;;  %v2960_v48 = vpop.permute.xlu0 %824 }
 0x2fe   : > { %v881_v49 = vpop.permute.xlu1 %880  ;;  %886 = vrot.lane.b32.xlu0 %v2762_v8, %s2511_s30 }
 0x2ff   : > { %v897_v50 = vsel %vm372_vm7, %v881_v49, %v883_v39  ;;  %v896_v51 = vsel %vm372_vm7, %v879_v36, %v881_v49 }
 0x300   : > { %888 = vrot.lane.b32.xlu1 %v2860_v26, %s2511_s30  ;;  %1015 = vmatprep.subr.mxu0 %v897_v50  ;;  %v2968_v52 = vpop.permute.xlu0 %758 }
 0x301   : > { %1016 = vmatpush1.msra.mxu0 %v896_v51 }
 0x302   : > { %v2970_v53 = vpop.permute.xlu1 %814  ;;  %884 = vrot.lane.b32.xlu0 %v2800_v14, %s2511_s30 }
 0x304   : > { %994 = vperm.xlu1 %2487, %v2662_v18   ;;  %v2975_v54 = vpop.permute.xlu0 %849 }
 0x306   : > { %v2977_v55 = vpop.permute.xlu1 %748  ;;  %999 = vperm.xlu0 %2488, %v2657_v17  }
 0x308   : > { %1407 = vrot.lane.b32.xlu1 %v2794_v9, %s2516_s11  ;;  %v2982_v56 = vpop.permute.xlu0 %818 }
 0x30a   : > { %v2984_v57 = vpop.permute.xlu1 %946  ;;  %1405 = vrot.lane.b32.xlu0 %v2813_v16, %s2516_s11 }
 0x30c   : > { %1403 = vrot.lane.b32.xlu1 %v2747_v1, %s2516_s11  ;;  %v2990_v18 = vpop.permute.xlu0 %783 }
 0x30e   : > { %v2992_v58 = vpop.permute.xlu1 %956  ;;  %1409 = vrot.lane.b32.xlu0 %v2855_v25, %s2516_s11 }
 0x310   : > { %1686 = vrot.lane.b32.xlu1 %v2762_v8, %s2510_s29  ;;  %v2998_v17 = vpop.permute.xlu0 %752 }
 0x312   : > { %v3000_v59 = vpop.permute.xlu1 %847  ;;  %1688 = vrot.lane.b32.xlu0 %v2860_v26, %s2510_s29 }
 0x314   : > { %1356 = vrot.lane.b32.xlu1 %v2762_v8, %s2515_s10  ;;  %v3006_v60 = vpop.permute.xlu0 %717 }
 0x316   : > { %v3008_v61 = vpop.permute.xlu1 %781  ;;  %1684 = vrot.lane.b32.xlu0 %v2800_v14, %s2510_s29 }
 0x318   : > { %1680 = vrot.lane.b32.xlu1 %v2785_v13, %s2510_s29  ;;  %v3014_v62 = vpop.permute.xlu0 %950 }
 0x31a   : > { %v3016_v2 = vpop.permute.xlu1 %715  ;;  %1358 = vrot.lane.b32.xlu0 %v2860_v26, %s2515_s10 }
 0x31c   : > { %1354 = vrot.lane.b32.xlu1 %v2800_v14, %s2515_s10  ;;  %v829_v3 = vpop.permute.xlu0 %828 }
 0x31e   : > { %v827_v4 = vpop.permute.xlu1 %826  ;;  %1682 = vrot.lane.b32.xlu0 %v2756_v6, %s2510_s29 }
 0x31f   : > { %v835_v24 = vsel %vm348_vm10, %v827_v4, %v829_v3 }
 0x320   : > { %1350 = vrot.lane.b32.xlu1 %v2785_v13, %s2515_s10  ;;  %v3026_v5 = vpop.permute.xlu0 %762 }
 0x322   : > { %v3028_v7 = vpop.permute.xlu1 %760  ;;  %1678 = vrot.lane.b32.xlu0 %v2742_v63, %s2510_s29 }
 0x324   : > { %1348 = vrot.lane.b32.xlu1 %v2742_v63, %s2515_s10  ;;  %v3034_v10 = vpop.permute.xlu0 %960 }
 0x326   : > { %v3036_v11 = vpop.permute.xlu1 %958  ;;  %1352 = vrot.lane.b32.xlu0 %v2756_v6, %s2515_s10 }
 0x328   : > { %1295 = vrot.lane.b32.xlu1 %v2813_v16, %s2517_s14  ;;  %v858_v15 = vpop.permute.xlu0 %857 }
 0x32a   : > { %v3042_v23 = vpop.permute.xlu1 %892  ;;  %1629 = vrot.lane.b32.xlu0 %v2855_v25, %s2512_s7 }
 0x32c   : > { %1299 = vrot.lane.b32.xlu1 %v2855_v25, %s2517_s14  ;;  %v3048_v27 = vpop.permute.xlu0 %820 }
 0x32e   : > { %v852_v30 = vpop.permute.xlu1 %851  ;;  %1627 = vrot.lane.b32.xlu0 %v2794_v9, %s2512_s7 }
 0x330   : > { %1578 = vrot.lane.b32.xlu1 %v2860_v26, %s2511_s30  ;;  %v3054_v32 = vpop.permute.xlu0 %791 }
 0x332   : > { %v823_v33 = vpop.permute.xlu1 %822  ;;  %1297 = vrot.lane.b32.xlu0 %v2794_v9, %s2517_s14 }
 0x334   : > { %1625 = vrot.lane.b32.xlu1 %v2813_v16, %s2512_s7  ;;  %v3060_v36 = vpop.permute.xlu0 %754 }
 0x336   : > { %v3062_v39 = vpop.permute.xlu1 %785  ;;  %1293 = vrot.lane.b32.xlu0 %v2747_v1, %s2517_s14 }
 0x338   : > { %1623 = vrot.lane.b32.xlu1 %v2747_v1, %s2512_s7  ;;  %v3068_v44 = vpop.permute.xlu0 %725 }
 0x33a   : > { %v3070_v49 = vpop.permute.xlu1 %756  ;;  %1572 = vrot.lane.b32.xlu0 %v2756_v6, %s2511_s30 }
 0x33c   : > { %1576 = vrot.lane.b32.xlu1 %v2762_v8, %s2511_s30  ;;  %v3076_v50 = vpop.permute.xlu0 %952 }
 0x33e   : > { %v3078_v51 = vpop.permute.xlu1 %719  ;;  %1517 = vrot.lane.b32.xlu0 %v2794_v9, %s2514_s9 }
 0x340   : > { %1570 = vrot.lane.b32.xlu1 %v2785_v13, %s2511_s30  ;;  %v3084_v0 = vpop.permute.xlu0 %923 }
 0x342   : > { %v3086_v1 = vpop.permute.xlu1 %954  ;;  %1574 = vrot.lane.b32.xlu0 %v2800_v14, %s2511_s30 }
 0x344   : > { %1568 = vrot.lane.b32.xlu1 %v2742_v63, %s2511_s30  ;;  %v860_v25 = vpop.permute.xlu0 %859 }
 0x345   : > { %v867_v28 = vsel %vm360_vm9, %v858_v15, %v860_v25  ;;  %v864_v15 = vsel %vm360_vm9, %v3000_v59, %v2975_v54 }
 0x346   : > { %v862_v16 = vpop.permute.xlu1 %861  ;;  %1468 = vrot.lane.b32.xlu0 %v2860_v26, %s2513_s8 }
 0x347   : > { %1095 = vmatpush1.msra.mxu1 %v862_v16  ;;  %v868_v9 = vsel %vm360_vm9, %v860_v25, %v862_v16  ;;  %v982_v16 = vsel %vm399_vm5, %v829_v3, %v2975_v54  ;;  %v834_v25 = vsel %vm348_vm10, %v2960_v48, %v827_v4  ;;  %v981_v48 = vsel %vm399_vm5, %v835_v24, %v864_v15  ;;  %v3173_v15 = vld [vmem:[#allocation2 + $0x48] sm:$0xff] }
 0x348   : > { %1462 = vrot.lane.b32.xlu1 %v2756_v6, %s2513_s8  ;;  %1017 = vmatprep.subr.mxu0 %v868_v9  ;;  %v856_v29 = vpop.permute.xlu0 %855  ;;  %v832_v24 = vsel %vm348_vm10, %v2982_v56, %v3048_v27  ;;  %v830_v4 = vsel %vm348_vm10, %v2920_v38, %v2970_v53 }
 0x349   : > { %1096 = vmatprep.subr.mxu1 %v4164_v21  ;;  %1018 = vmatpush1.msra.mxu0 %v867_v28 }
 0x34a   : > { %1097 = vmatpush1.msra.mxu1 %v856_v29  ;;  %v854_v31 = vpop.permute.xlu1 %853  ;;  %1411 = vrot.lane.b32.xlu0 %v2902_v35, %s2516_s11 }
 0x34b   : > { %1098 = vmatprep.subr.mxu1 %v4164_v21  ;;  %v866_v9 = vsel %vm360_vm9, %v854_v31, %v856_v29  ;;  %v865_v22 = vsel %vm360_vm9, %v852_v30, %v854_v31  ;;  %v863_v31 = vsel %vm360_vm9, %v2946_v45, %v3000_v59  ;;  %v831_v59 = vsel %vm348_vm10, %v2970_v53, %v2933_v41 }
 0x34c   : > { %1099 = vmatpush1.msra.mxu1 %v982_v16  ;;  %1413 = vrot.lane.b32.xlu1 %v2895_v34, %s2516_s11  ;;  %v3111_v28 = vpop.permute.xlu0 %894  ;;  %v980_v3 = vsel %vm399_vm5, %v834_v25, %v863_v31  ;;  %v768_v53 = vsel %vm324_vm12, %v2968_v52, %v3028_v7  ;;  %v798_v16 = vsel %vm336_vm11, %v3008_v61, %v2990_v18 }
 0x34d   : > { %1019 = vmatprep.subr.mxu0 %v866_v9  ;;  %1100 = vmatprep.subr.mxu1 %v4164_v21  ;;  %v797_v52 = vsel %vm336_vm11, %v2954_v47, %v3008_v61  ;;  %v767_v47 = vsel %vm324_vm12, %v3060_v36, %v3070_v49  ;;  %v765_v61 = vsel %vm324_vm12, %v2977_v55, %v2941_v43 }
 0x34e   : > { %1020 = vmatpush1.msra.mxu0 %v865_v22  ;;  %1101 = vmatpush1.msra.mxu1 %v823_v33  ;;  %v796_v29 = vpop.permute.xlu1 %795  ;;  %v833_v22 = vsel %vm348_vm10, %v3048_v27, %v823_v33  ;;  %v732_v31 = vsel %vm312_vm13, %v3016_v2, %v3006_v60 }
 0x34f   : > { %1633 = vrot.lane.b32.xlu0 %v2895_v34, %s2512_s7  ;;  %1021 = vmatprep.subr.mxu0 %v981_v48 }
 0x350   : > { %1102 = vmatprep.subr.mxu1 %v4164_v21  ;;  %1022 = vmatpush1.msra.mxu0 %v980_v3  ;;  %v794_v54 = vpop.permute.xlu0 %793 }
 0x351   : > { %1103 = vmatpush1.msra.mxu1 %v2933_v41  ;;  %1631 = vrot.lane.b32.xlu1 %v2902_v35, %s2512_s7  ;;  %v802_v56 = vsel %vm336_vm11, %v794_v54, %v796_v29  ;;  %v769_v41 = vsel %vm324_vm12, %v3028_v7, %v3026_v5  ;;  %v801_v33 = vsel %vm336_vm11, %v3054_v32, %v794_v54 }
 0x352   : > { %1023 = vmatprep.subr.mxu0 %v833_v22  ;;  %1104 = vmatprep.subr.mxu1 %v4164_v21  ;;  %v788_v45 = vpop.permute.xlu1 %787  ;;  %v979_v32 = vsel %vm399_vm5, %v3026_v5, %v2990_v18  ;;  %v978_v7 = vsel %vm399_vm5, %v769_v41, %v798_v16  ;;  %v764_v5 = vsel %vm324_vm12, %v2926_v40, %v2977_v55 }
 0x353   : > { %1024 = vmatpush1.msra.mxu0 %v832_v24  ;;  %1105 = vmatpush1.msra.mxu1 %v796_v29  ;;  %v799_v9 = vsel %vm336_vm11, %v3062_v39, %v788_v45  ;;  %v731_v55 = vsel %vm312_vm13, %v2918_v37, %v3016_v2 }
 0x354   : > { %1303 = vrot.lane.b32.xlu0 %v2895_v34, %s2517_s14  ;;  %1025 = vmatprep.subr.mxu0 %v831_v59  ;;  %v790_v30 = vpop.permute.xlu0 %789  ;;  %v974_v37 = vsel %vm399_vm5, %v2781_v12, %v731_v55  ;;  %v967_v12 = vsel %vm396_vm6, %v3036_v11, %v3034_v10  ;;  %v986_v59 = vld [vmem:[%s4103_s2] sm:$0xff]  ;;  %v4167_v55 = vld [vmem:[#allocation5_spill] sm:$0xff] }
 0x355   : > { %1026 = vmatpush1.msra.mxu0 %v830_v4  ;;  %1301 = vrot.lane.b32.xlu1 %v2902_v35, %s2517_s14  ;;  %v800_v27 = vsel %vm336_vm11, %v788_v45, %v790_v30  ;;  %v989_v4 = vld [vmem:[%s4103_s2 + $0x18] sm:$0xff] }
 0x356   : > { %1027 = vmatprep.subr.mxu0 %v802_v56  ;;  %1106 = vmatprep.subr.mxu1 %v4164_v21  ;;  %v3152_v38 = vpop.permute.xlu1 %913 }
 0x357   : > { %1028 = vmatpush1.msra.mxu0 %v801_v33  ;;  %1107 = vmatpush1.msra.mxu1 %v790_v30  ;;  %v988_v30 = vld [vmem:[%s4103_s2 + $0x10] sm:$0xff] }
 0x358   : > { %1029 = vmatprep.subr.mxu0 %v800_v27  ;;  %1108 = vmatprep.subr.mxu1 %v4164_v21  ;;  %v728_v25 = vpop.permute.xlu0 %727  ;;  %v977_v21 = vsel %vm399_vm5, %v768_v53, %v797_v52 }
 0x359   : > { %1030 = vmatpush1.msra.mxu0 %v799_v9  ;;  %1109 = vmatpush1.msra.mxu1 %v979_v32 }
 0x35a   : > { %1523 = vrot.lane.b32.xlu1 %v2895_v34, %s2514_s9  ;;  %1031 = vmatprep.subr.mxu0 %v978_v7  ;;  %v730_v39 = vpop.permute.xlu1 %729  ;;  %v766_v34 = vsel %vm324_vm12, %v2998_v17, %v3060_v36 }
 0x35b   : > { %1110 = vmatprep.subr.mxu1 %v3173_v15  ;;  %1032 = vmatpush1.msra.mxu0 %v977_v21  ;;  %v736_v17 = vsel %vm312_vm13, %v728_v25, %v730_v39 }
 0x35c   : > { %1111 = vmatpush1.msra.mxu1 %v3070_v49  ;;  %1033 = vmatprep.subr.mxu0 %v767_v47  ;;  %v724_v18 = vpop.permute.xlu0 %723 }
 0x35d   : > { %1112 = vmatprep.subr.mxu1 %v3173_v15  ;;  %1034 = vmatpush1.msra.mxu0 %v766_v34 }
 0x35e   : > { %1113 = vmatpush1.msra.mxu1 %v2941_v43  ;;  %1035 = vmatprep.subr.mxu0 %v765_v61  ;;  %v722_v49 = vpop.permute.xlu1 %721  ;;  %v735_v43 = vsel %vm312_vm13, %v3068_v44, %v728_v25  ;;  %v976_v44 = vsel %vm399_vm5, %v2825_v19, %v3006_v60 }
 0x35f   : > { %1114 = vmatprep.subr.mxu1 %v3173_v15  ;;  %1036 = vmatpush1.msra.mxu0 %v764_v5  ;;  %v734_v36 = vsel %vm312_vm13, %v722_v49, %v724_v18  ;;  %v733_v40 = vsel %vm312_vm13, %v3078_v51, %v722_v49  ;;  %v975_v51 = vsel %vm399_vm5, %v2829_v20, %v732_v31 }
 0x360   : > { %1115 = vmatpush1.msra.mxu1 %v730_v39  ;;  %1037 = vmatprep.subr.mxu0 %v736_v17  ;;  %v3199_v29 = vpop.permute.xlu0 %915  ;;  %v963_v20 = vsel %vm396_vm6, %v2984_v57, %v2952_v46  ;;  %v4165_v39 = vld [vmem:[#allocation3_spill] sm:$0xff] }
 0x361   : > { %1116 = vmatprep.subr.mxu1 %v3173_v15  ;;  %1038 = vmatpush1.msra.mxu0 %v735_v43 }
 0x362   : > { %1117 = vmatpush1.msra.mxu1 %v724_v18  ;;  %1039 = vmatprep.subr.mxu0 %v734_v36  ;;  %v918_v48 = vpop.permute.xlu1 %917 }
 0x363   : > { %1118 = vmatprep.subr.mxu1 %v3173_v15  ;;  %1040 = vmatpush1.msra.mxu0 %v733_v40 }
 0x364   : > { %1119 = vmatpush1.msra.mxu1 %v976_v44  ;;  %1041 = vmatprep.subr.mxu0 %v975_v51  ;;  %v891_v2 = vpop.permute.xlu0 %890 }
 0x365   : > { %1120 = vmatprep.subr.mxu1 %v3173_v15  ;;  %1042 = vmatpush1.msra.mxu0 %v974_v37  ;;  %v900_v54 = vsel %vm372_vm7, %v891_v2, %v3042_v23 }
 0x366   : > { %1121 = vmatpush1.msra.mxu1 %v2860_v26  ;;  %1043 = vmatprep.subr.mxu0 %v2762_v8  ;;  %v912_v3 = vpop.permute.xlu1 %911  ;;  %v966_v8 = vsel %vm396_vm6, %v2992_v58, %v3036_v11  ;;  %v901_v11 = vsel %vm372_vm7, %v3042_v23, %v3111_v28 }
 0x367   : > { %1122 = vmatprep.subr.mxu1 %v3173_v15  ;;  %1044 = vmatpush1.msra.mxu0 %v2800_v14 }
 0x368   : > { %1123 = vmatpush1.msra.mxu1 %v2756_v6  ;;  %1045 = vmatprep.subr.mxu0 %v2785_v13  ;;  %v926_v19 = vpop.permute.xlu0 %925  ;;  %v964_v13 = vsel %vm396_vm6, %v3014_v62, %v3076_v50  ;;  %v930_v62 = vsel %vm384_vm8, %v3152_v38, %v3199_v29 }
 0x369   : > { %1142 = vmatprep.subr.mxu1 %v3173_v15  ;;  %1046 = vmatpush1.msra.mxu0 %v2742_v63  ;;  %v965_v63 = vsel %vm396_vm6, %v3076_v50, %v3086_v1  ;;  %v985_v50 = vsel %vm399_vm5, %v3111_v28, %v3199_v29  ;;  %v984_v22 = vsel %vm399_vm5, %v901_v11, %v930_v62 }
 0x36a   : > { %2360 = vmatpush2.msk.msra.mxu1 %vm399_vm5, %v3034_v10  ;;  %2356 = vmatprep.subr.msk.mxu0 %vm399_vm5, %v967_v12  ;;  %v928_v6 = vpop.permute.xlu1 %927 }
 0x36b   : > { %1144 = vmatprep.subr.mxu1 %v3173_v15  ;;  %2357 = vmatpush2.msk.msra.mxu0 %vm399_vm5, %v966_v8  ;;  %v934_v58 = vsel %vm384_vm8, %v926_v19, %v928_v6 }
 0x36c   : > { %1145 = vmatpush2.msra.mxu1 %v3086_v1  ;;  %1067 = vmatprep.subr.mxu0 %v965_v63  ;;  %v922_v14 = vpop.permute.xlu0 %921  ;;  %v962_v1 = vsel %vm396_vm6, %v2935_v42, %v2984_v57  ;;  %v929_v57 = vsel %vm384_vm8, %v912_v3, %v3152_v38 }
 0x36d   : > { %1146 = vmatprep.subr.mxu1 %v3173_v15  ;;  %1068 = vmatpush2.msra.mxu0 %v964_v13  ;;  %v983_v45 = vsel %vm399_vm5, %v900_v54, %v929_v57 }
 0x36e   : > { %1147 = vmatpush2.msra.mxu1 %v2952_v46  ;;  %1069 = vmatprep.subr.mxu0 %v963_v20  ;;  %v920_v26 = vpop.permute.xlu1 %919  ;;  %v933_v46 = vsel %vm384_vm8, %v3084_v0, %v926_v19 }
 0x36f   : > { %1148 = vmatprep.subr.mxu1 %v3173_v15  ;;  %1070 = vmatpush2.msra.mxu0 %v962_v1  ;;  %v932_v60 = vsel %vm384_vm8, %v920_v26, %v922_v14  ;;  %v931_v42 = vsel %vm384_vm8, %v918_v48, %v920_v26 }
 0x370   : > { %1149 = vmatpush2.msra.mxu1 %v928_v6  ;;  %1071 = vmatprep.subr.mxu0 %v934_v58  ;;  %v887_v10 = vpop.permute.xlu0 %886 }
 0x371   : > { %1150 = vmatprep.subr.mxu1 %v3173_v15  ;;  %1072 = vmatpush2.msra.mxu0 %v933_v46 }
 0x372   : > { %1151 = vmatpush2.msra.mxu1 %v922_v14  ;;  %1073 = vmatprep.subr.mxu0 %v932_v60  ;;  %v889_v0 = vpop.permute.xlu1 %888 }
 0x373   : > { %1152 = vmatprep.subr.mxu1 %v3173_v15  ;;  %1074 = vmatpush2.msra.mxu0 %v931_v42  ;;  %v899_v24 = vsel %vm372_vm7, %v887_v10, %v889_v0 }
 0x374   : > { %1153 = vmatpush2.msra.mxu1 %v985_v50  ;;  %1075 = vmatprep.subr.mxu0 %v984_v22  ;;  %v885_v28 = vpop.permute.xlu0 %884 }
 0x375   : > { %1154 = vmatprep.subr.mxu1 %v3173_v15  ;;  %1076 = vmatpush2.msra.mxu0 %v983_v45  ;;  %v898_v23 = vsel %vm372_vm7, %v885_v28, %v887_v10 }
 0x376   : > { %1155 = vmatpush2.msra.mxu1 %v889_v0  ;;  %1077 = vmatprep.subr.mxu0 %v899_v24 }
 0x377   : > { %1157 = vmatmul.mubr.f32.vlgmr.msra.gmra.mxu1 %v986_v59  ;;  %1078 = vmatpush2.msra.mxu0 %v898_v23 }
 0x378   : > { %1080 = vmatmul.mubr.f32.vlgmr.msra.gmra.mxu0 %v986_v59  ;;  %2362 = vmatprep.mubr.msk.f32.mxu1 %vm1002_vm4, %v989_v4 }
 0x379   : > { %2359 = vmatprep.mubr.msk.f32.mxu0 %vm1002_vm4, %v989_v4  ;;  %vm4183_vm4 = vcmask 711680  }
 0x37b   : > { %1162 = vmatmul.mubr.f32.gmra.mxu1 %v988_v30 }
 0x37c   : > { %1086 = vmatmul.mubr.f32.gmra.mxu0 %v988_v30  ;;  %1914 = vmatprep.mubr.f32.mxu1 %v3173_v15  ;;  %v4166_v15 = vld [vmem:[#allocation4_spill] sm:$0xff] }
 0x37f   : > { %v995_v56 = vpop.permute.xlu1 %994 }
 0x381   : > { %v1000_v25 = vpop.permute.xlu0 %999 }
 0x383   : > { %v3288_v27 = vpop.permute.xlu1 %1407 }
 0x385   : > { %v3299_v3 = vpop.permute.xlu0 %1405 }
 0x387   : > { %v3291_v61 = vpop.permute.xlu1 %1403 }
 0x389   : > { %v3308_v1 = vpop.permute.xlu0 %1409 }
 0x38b   : > { %v3301_v12 = vpop.permute.xlu1 %1686 }
 0x38d   : > { %v3316_v60 = vpop.permute.xlu0 %1688 }
 0x38f   : > { %v3310_v26 = vpop.permute.xlu1 %1356 }
 0x391   : > { %v3322_v10 = vpop.permute.xlu0 %1684 }
 0x393   : > { %v3318_v62 = vpop.permute.xlu1 %1680 }
 0x395   : > { %v3326_v57 = vpop.permute.xlu0 %1358 }
 0x397   : > { %v3324_v42 = vpop.permute.xlu1 %1354 }
 0x399   : > { %v3330_v50 = vpop.permute.xlu0 %1682 }
 0x39b   : > { %v3328_v11 = vpop.permute.xlu1 %1350 }
 0x39d   : > { %v3334_v54 = vpop.permute.xlu0 %1678 }
 0x39f   : > { %v3332_v0 = vpop.permute.xlu1 %1348 }
 0x3a1   : > { %v3338_v24 = vpop.permute.xlu0 %1352 }
 0x3a3   : > { %v3336_v22 = vpop.permute.xlu1 %1295 }
 0x3a5   : > { %v3342_v59 = vpop.permute.xlu0 %1629 }
 0x3a7   : > { %v3340_v45 = vpop.permute.xlu1 %1299 }
 0x3a9   : > { %v3346_v23 = vpop.permute.xlu0 %1627 }
 0x3ab   : > { %v3344_v28 = vpop.permute.xlu1 %1578 }
 0x3ad   : > { %v3350_v30 = vpop.permute.xlu0 %1297 }
 0x3af   : > { %v3348_v4 = vpop.permute.xlu1 %1625 }
 0x3b0   : > { %4168 = vst [vmem:[#allocation12_spill] sm:$0xff] %v3348_v4  ;;  %v2520_v4 = vmov 2  }
 0x3b1   : > { %2489 = vset.pattern.permute.xlu1 %v2520_v4  ;;  %2490 = vset.pattern.permute.xlu0 %v2520_v4 }
 0x437   : > { %v1158_v41 = vpop.f32.mrf.mxu1 }
 0x438   : > { %v1159_v33 = vadd.f32 %v1158_v41, %v995_v56  ;;  %v1081_v38 = vpop.f32.mrf.mxu0  ;;  %v3354_v41 = vpop.permute.xlu0 %1293 }
 0x439   : > { %v1160_v53 = vpop.f32.mrf.mxu1  ;;  %v1082_v16 = vadd.f32 %v1081_v38, %v995_v56 }
 0x43a   : > { %v1169_v9 = vmax.f32 %v1159_v33, 0.0  ;;  %v1083_v32 = vpop.f32.mrf.mxu0 }
 0x43b   : > { %v1167_v52 = vmax.f32 %v1082_v16, 0.0  ;;  %v1163_v7 = vpop.f32.mrf.mxu1  ;;  %v1084_v21 = vadd.f32 %v1083_v32, %v995_v56  ;;  %v3352_v56 = vpop.permute.xlu1 %1623 }
 0x43c   : > { %v1175_v47 = vmul.f32 %v1169_v9, %v4165_v39  ;;  %v1164_v34 = vadd.f32 %v1163_v7, %v1000_v25  ;;  %v1087_v18 = vpop.f32.mrf.mxu0  ;;  %4169 = vst [vmem:[#allocation13_spill] sm:$0xff] %v3352_v56  ;;  %v3358_v38 = vpop.permute.xlu0 %1572  ;;  %v3612_v56 = vld [vmem:[#allocation2] sm:$0xff] }
 0x43d   : > { %v1173_v5 = vmul.f32 %v1167_v52, %v4166_v15  ;;  %v1168_v49 = vmax.f32 %v1084_v21, 0.0  ;;  %v1088_v17 = vadd.f32 %v1087_v18, %v1000_v25  ;;  %v1165_v36 = vpop.f32.mrf.mxu1  ;;  %4171 = vst [vmem:[#allocation15_spill] sm:$0xff] %v3358_v38  ;;  %4200 = vst [vmem:[#allocation31_spill] sm:$0xff] %v3612_v56 }
 0x43e   : > { %v1187_v31 = vrot.slane %v1175_v47, 4  ;;  %v1172_v43 = vmax.f32 %v1164_v34, 0.0  ;;  %v1089_v29 = vpop.f32.mrf.mxu0 }
 0x43f   : > { %v1185_v40 = vrot.slane %v1173_v5, 4  ;;  %v1174_v48 = vmul.f32 %v1168_v49, %v4167_v55  ;;  %v1170_v44 = vmax.f32 %v1088_v17, 0.0  ;;  %v1090_v51 = vadd.f32 %v1089_v29, %v1000_v25  ;;  %v3356_v33 = vpop.permute.xlu1 %1576 }
 0x440   : > { %v1178_v37 = vmul.f32 %v1172_v43, %v4165_v39  ;;  %1198 = vrot.lane.b32.xlu0 %v1187_v31, %s2509_s28  ;;  %4170 = vst [vmem:[#allocation14_spill] sm:$0xff] %v3356_v33  ;;  %v3362_v16 = vpop.permute.xlu0 %1517  ;;  %v4189_v39 = vld [vmem:[#allocation9_spill] sm:$0xff] }
 0x441   : > { %v1176_v2 = vmul.f32 %v1170_v44, %v4166_v15  ;;  %1194 = vrot.lane.b32.xlu1 %v1185_v40, %s2509_s28  ;;  %v1186_v8 = vrot.slane %v1174_v48, 4  ;;  %v1171_v63 = vmax.f32 %v1090_v51, 0.0  ;;  %4173 = vst [vmem:[#allocation17_spill] sm:$0xff] %v3362_v16  ;;  %v3602_v16 = vld [vmem:[#allocation2 + $0x8] sm:$0xff] }
 0x442   : > { %v1192_v19 = vrot.slane %v1178_v37, 4  ;;  %4197 = vst [vmem:[#allocation28_spill] sm:$0xff] %v3602_v16 }
 0x443   : > { %v1188_v6 = vrot.slane %v1176_v2, 4  ;;  %v1177_v20 = vmul.f32 %v1171_v63, %v4167_v55  ;;  %v3360_v53 = vpop.permute.xlu1 %1570  ;;  %v4180_v2 = vld [vmem:[#allocation8_spill] sm:$0xff] }
 0x444   : > { %v1193_v13 = vsel %vm399_vm5, %v1187_v31, %v1192_v19  ;;  %4172 = vst [vmem:[#allocation16_spill] sm:$0xff] %v3360_v53  ;;  %v3366_v32 = vpop.permute.xlu0 %1574  ;;  %v3591_v53 = vld [vmem:[#allocation2 + $0x18] sm:$0xff] }
 0x445   : > { %1204 = vrot.lane.b32.xlu0 %v1193_v13, %s2509_s28  ;;  %1196 = vrot.lane.b32.xlu1 %v1186_v8, %s2509_s28  ;;  %v1189_v14 = vsel %vm399_vm5, %v1185_v40, %v1188_v6  ;;  %v1190_v58 = vrot.slane %v1177_v20, 4  ;;  %4175 = vst [vmem:[#allocation19_spill] sm:$0xff] %v3366_v32  ;;  %4195 = vst [vmem:[#allocation26_spill] sm:$0xff] %v3591_v53 }
 0x447   : > { %v1191_v46 = vsel %vm399_vm5, %v1186_v8, %v1190_v58  ;;  %v3364_v9 = vpop.permute.xlu1 %1568 }
 0x448   : > { %4174 = vst [vmem:[#allocation18_spill] sm:$0xff] %v3364_v9  ;;  %v3370_v52 = vpop.permute.xlu0 %1468 }
 0x449   : > { %1200 = vrot.lane.b32.xlu0 %v1189_v14, %s2509_s28  ;;  %1210 = vrot.lane.b32.xlu1 %v1192_v19, %s2509_s28  ;;  %4177 = vst [vmem:[#allocation21_spill] sm:$0xff] %v3370_v52  ;;  %v3586_v52 = vld [vmem:[%s4104_s3 + $0x8] sm:$0xff] }
 0x44a   : > { %1837 = vmatprep.mubr.f32.mxu0 %v3586_v52 }
 0x44b   : > { %v3368_v25 = vpop.permute.xlu1 %1462 }
 0x44c   : > { %4176 = vst [vmem:[#allocation20_spill] sm:$0xff] %v3368_v25  ;;  %v3374_v21 = vpop.permute.xlu0 %1411 }
 0x44d   : > { %1208 = vrot.lane.b32.xlu0 %v1190_v58, %s2509_s28  ;;  %1206 = vrot.lane.b32.xlu1 %v1188_v6, %s2509_s28 }
 0x44f   : > { %v3372_v7 = vpop.permute.xlu1 %1413 }
 0x450   : > { %v3378_v34 = vpop.permute.xlu0 %1633 }
 0x451   : > { %1202 = vrot.lane.b32.xlu1 %v1191_v46, %s2509_s28 }
 0x453   : > { %v3376_v47 = vpop.permute.xlu1 %1631 }
 0x454   : > { %v3382_v5 = vpop.permute.xlu0 %1303 }
 0x457   : > { %v3380_v18 = vpop.permute.xlu1 %1301 }
 0x45b   : > { %v3384_v49 = vpop.permute.xlu1 %1523 }
 0x45c   : > { %4178 = vst [vmem:[#allocation22_spill] sm:$0xff] %v3384_v49 }
 0x4b2   : > { %v1199_v17 = vpop.permute.xlu0 %1198 }
 0x4b3   : > { %v1195_v36 = vpop.permute.xlu1 %1194 }
 0x4b4   : > { %1227 = vst.msk [vmem:[#allocation2 + $0x30] sm:$0xf0] %vm667_vm14, %v1195_v36 }
 0x4b7   : > { %v1205_v31 = vpop.permute.xlu0 %1204  ;;  %v1197_v43 = vpop.permute.xlu1 %1196 }
 0x4b8   : > { %v1212_v29 = vsel %vm285_vm2, %v1195_v36, %v1197_v43  ;;  %v1213_v40 = vsel %vm285_vm2, %v1197_v43, %v1199_v17 }
 0x4b9   : > { %1228 = vst [vmem:[#allocation2 + $0x38] sm:$0xf0] %v1212_v29  ;;  %1229 = vst.msk [vmem:[#allocation2 + $0x40] sm:$0xf0] %vm670_vm15, %v1213_v40  ;;  %v4184_v29 = vld [vmem:[#allocation10_spill] sm:$0xff] }
 0x4bb   : > { %v1201_v48 = vpop.permute.xlu0 %1200  ;;  %v1211_v44 = vpop.permute.xlu1 %1210  ;;  %v3390_v51 = vld [vmem:[#allocation2 + $0x30] sm:$0xff] }
 0x4bc   : > { %4179 = vst [vmem:[#allocation23_spill] sm:$0xff] %v3390_v51  ;;  %1230 = vst.msk [vmem:[#allocation2 + $0x48] sm:$0xff] %vm672_vm0, %v1201_v48  ;;  %1360 = vrot.lane.b32.xlu1 %v3390_v51, %s2515_s10  ;;  %1690 = vrot.lane.b32.xlu0 %v3390_v51, %s2510_s29  ;;  %v1275_v37 = vrot.slane %v3390_v51, 4 }
 0x4be   : > { %v1276_v19 = vsel %vm399_vm5, %v4180_v2, %v1275_v37 }
 0x4bf   : > { %v1209_v8 = vpop.permute.xlu0 %1208  ;;  %v1207_v6 = vpop.permute.xlu1 %1206 }
 0x4c0   : > { %v1217_v63 = vsel %vm285_vm2, %v1209_v8, %v1211_v44  ;;  %v1216_v13 = vsel %vm285_vm2, %v1207_v6, %v1209_v8  ;;  %1233 = vst.msk [vmem:[#allocation2 + $0x60] sm:$0xf] %vm291_vm1, %v1207_v6  ;;  %1415 = vrot.lane.b32.xlu1 %v1276_v19, %s2516_s11  ;;  %1580 = vrot.lane.b32.xlu0 %v3390_v51, %s2511_s30  ;;  %v3409_v20 = vld [vmem:[#allocation2 + $0x38] sm:$0xff]  ;;  %v3411_v58 = vld [vmem:[#allocation2 + $0x40] sm:$0xff]  ;;  %v4185_v44 = vld [vmem:[#allocation11_spill] sm:$0xff] }
 0x4c1   : > { %1235 = vst.msk [vmem:[#allocation2 + $0x70] sm:$0xf] %vm294_vm3, %v1217_v63  ;;  %1234 = vst [vmem:[#allocation2 + $0x68] sm:$0xf] %v1216_v13  ;;  %v1277_v43 = vrot.slane %v3409_v20, 4 }
 0x4c2   : > { %4181 = vst [vmem:[#allocation8_spill] sm:$0xff] %v3409_v20  ;;  %4182 = vst [vmem:[#allocation24_spill] sm:$0xff] %v3411_v58 }
 0x4c3   : > { %v1203_v14 = vpop.permute.xlu1 %1202  ;;  %v1278_v40 = vsel %vm399_vm5, %v4184_v29, %v1277_v43 }
 0x4c4   : > { %v3414_v46 = vsel %vm285_vm2, %v1201_v48, %v1203_v14  ;;  %v1215_v17 = vsel %vm285_vm2, %v1203_v14, %v1205_v31  ;;  %1692 = vrot.lane.b32.xlu1 %v3409_v20, %s2510_s29  ;;  %1694 = vrot.lane.b32.xlu0 %v3411_v58, %s2510_s29  ;;  %v3438_v31 = vld [vmem:[#allocation2 + $0x48] sm:$0xff]  ;;  %v1279_v48 = vrot.slane %v3411_v58, 4 }
 0x4c5   : > { %1232 = vst.msk [vmem:[#allocation2 + $0x58] sm:$0xff] %vm4183_vm4, %v1215_v17  ;;  %v1281_v13 = vrot.slane %v3438_v31, 4  ;;  %v1283_v29 = vrot.slane %v3414_v46, 4 }
 0x4c6   : > { %v1280_v2 = vsel %vm399_vm5, %v4185_v44, %v1279_v48 }
 0x4c7   : > { %v3432_v36 = vld [vmem:[#allocation2 + $0x60] sm:$0xf]  ;;  %v3499_v17 = vsel %vm399_vm5, %v1275_v37, %v1281_v13 }
 0x4c8   : > { %1362 = vrot.lane.b32.xlu1 %v3409_v20, %s2515_s10  ;;  %1364 = vrot.lane.b32.xlu0 %v3411_v58, %s2515_s10  ;;  %v3477_v6 = vld [vmem:[#allocation2 + $0x68] sm:$0xf]  ;;  %v1287_v63 = vrot.slane %v3432_v36, 4 }
 0x4c9   : > { %v1289_v37 = vrot.slane %v3477_v6, 4 }
 0x4ca   : > { %v3490_v14 = vsel %vm399_vm5, %v1281_v13, %v1287_v63  ;;  %v1284_v13 = vsel %vm399_vm5, %v1277_v43, %v1283_v29 }
 0x4cc   : > { %1305 = vrot.lane.b32.xlu1 %v1276_v19, %s2517_s14  ;;  %1635 = vrot.lane.b32.xlu0 %v1276_v19, %s2512_s7  ;;  %v3475_v8 = vld [vmem:[#allocation2 + $0x58] sm:$0xff] }
 0x4cd   : > { %4187 = vst [vmem:[#allocation11_spill] sm:$0xff] %v3475_v8  ;;  %v1285_v44 = vrot.slane %v3475_v8, 4 }
 0x4d0   : > { %1474 = vrot.lane.b32.xlu1 %v3411_v58, %s2513_s8  ;;  %1584 = vrot.lane.b32.xlu0 %v3411_v58, %s2511_s30 }
 0x4d4   : > { %1702 = vrot.lane.b32.xlu1 %v3432_v36, %s2510_s29  ;;  %1582 = vrot.lane.b32.xlu0 %v3409_v20, %s2511_s30 }
 0x4d8   : > { %1525 = vrot.lane.b32.xlu0 %v1276_v19, %s2514_s9  ;;  %1366 = vrot.lane.b32.xlu1 %v3438_v31, %s2515_s10  ;;  %v3461_v19 = vld [vmem:[#allocation2 + $0x70] sm:$0xf] }
 0x4d9   : > { %4186 = vst [vmem:[#allocation10_spill] sm:$0xff] %v3461_v19 }
 0x4dc   : > { %1372 = vrot.lane.b32.xlu0 %v3432_v36, %s2515_s10  ;;  %1586 = vrot.lane.b32.xlu1 %v3438_v31, %s2511_s30 }
 0x4e0   : > { %1592 = vrot.lane.b32.xlu0 %v3432_v36, %s2511_s30  ;;  %1417 = vrot.lane.b32.xlu1 %v1278_v40, %s2516_s11 }
 0x4e4   : > { %1637 = vrot.lane.b32.xlu1 %v1278_v40, %s2512_s7  ;;  %1696 = vrot.lane.b32.xlu0 %v3438_v31, %s2510_s29 }
 0x4e8   : > { %1307 = vrot.lane.b32.xlu1 %v1278_v40, %s2517_s14  ;;  %1419 = vrot.lane.b32.xlu0 %v1280_v2, %s2516_s11 }
 0x4ec   : > { %1639 = vrot.lane.b32.xlu0 %v1280_v2, %s2512_s7  ;;  %1706 = vrot.lane.b32.xlu1 %v3461_v19, %s2510_s29 }
 0x4f0   : > { %1309 = vrot.lane.b32.xlu0 %v1280_v2, %s2517_s14  ;;  %1376 = vrot.lane.b32.xlu1 %v3461_v19, %s2515_s10 }
 0x4f4   : > { %1529 = vrot.lane.b32.xlu0 %v1280_v2, %s2514_s9  ;;  %1596 = vrot.lane.b32.xlu1 %v3461_v19, %s2511_s30  ;;  %v1291_v2 = vrot.slane %v3461_v19, 4 }
 0x4f6   : > { %v1292_v63 = vsel %vm399_vm5, %v1285_v44, %v1291_v2  ;;  %v4188_v2 = vld [vmem:[#allocation7_spill] sm:$0xff] }
 0x4f8   : > { %1527 = vrot.lane.b32.xlu0 %v1278_v40, %s2514_s9  ;;  %1486 = vrot.lane.b32.xlu1 %v3461_v19, %s2513_s8  ;;  %v1290_v40 = vsel %vm399_vm5, %v1283_v29, %v1289_v37  ;;  %v1286_v37 = vsel %vm399_vm5, %v1279_v48, %v1285_v44 }
 0x4fc   : > { %1700 = vrot.lane.b32.xlu1 %v3475_v8, %s2510_s29  ;;  %1704 = vrot.lane.b32.xlu0 %v3477_v6, %s2510_s29 }
 0x500   : > { %1368 = vrot.lane.b32.xlu1 %v3414_v46, %s2515_s10  ;;  %1374 = vrot.lane.b32.xlu0 %v3477_v6, %s2515_s10 }
 0x504   : > { %1317 = vrot.lane.b32.xlu1 %v3490_v14, %s2517_s14  ;;  %1594 = vrot.lane.b32.xlu0 %v3477_v6, %s2511_s30 }
 0x508   : > { %1311 = vrot.lane.b32.xlu1 %v3499_v17, %s2517_s14  ;;  %1698 = vrot.lane.b32.xlu0 %v3414_v46, %s2510_s29 }
 0x50c   : > { %1590 = vrot.lane.b32.xlu1 %v3475_v8, %s2511_s30  ;;  %1370 = vrot.lane.b32.xlu0 %v3475_v8, %s2515_s10 }
 0x510   : > { %1588 = vrot.lane.b32.xlu1 %v3414_v46, %s2511_s30  ;;  %1647 = vrot.lane.b32.xlu0 %v3490_v14, %s2512_s7 }
 0x514   : > { %1531 = vrot.lane.b32.xlu1 %v3499_v17, %s2514_s9  ;;  %1641 = vrot.lane.b32.xlu0 %v3499_v17, %s2512_s7 }
 0x518   : > { %1480 = vrot.lane.b32.xlu0 %v3475_v8, %s2513_s8  ;;  %1649 = vrot.lane.b32.xlu1 %v1290_v40, %s2512_s7 }
 0x51c   : > { %1537 = vrot.lane.b32.xlu0 %v3490_v14, %s2514_s9  ;;  %1319 = vrot.lane.b32.xlu1 %v1290_v40, %s2517_s14 }
 0x520   : > { %1651 = vrot.lane.b32.xlu0 %v1292_v63, %s2512_s7  ;;  %1643 = vrot.lane.b32.xlu1 %v1284_v13, %s2512_s7 }
 0x524   : > { %1321 = vrot.lane.b32.xlu0 %v1292_v63, %s2517_s14  ;;  %1313 = vrot.lane.b32.xlu1 %v1284_v13, %s2517_s14 }
 0x528   : > { %1645 = vrot.lane.b32.xlu0 %v1286_v37, %s2512_s7  ;;  %1521 = vrot.lane.b32.xlu1 %v2902_v35, %s2514_s9 }
 0x52c   : > { %1315 = vrot.lane.b32.xlu0 %v1286_v37, %s2517_s14  ;;  %1484 = vrot.lane.b32.xlu1 %v3477_v6, %s2513_s8 }
 0x52e   : > { %v3541_v43 = vpop.permute.xlu1 %1360  ;;  %v3543_v29 = vpop.permute.xlu0 %1690 }
 0x530   : > { %1515 = vrot.lane.b32.xlu0 %v4188_v2, %s2514_s9  ;;  %1519 = vrot.lane.b32.xlu1 %v4189_v39, %s2514_s9  ;;  %v4191_v2 = vld [vmem:[#allocation6_spill] sm:$0xff] }
 0x531   : > { %4193 = vst [vmem:[#allocation6_spill] sm:$0xff] %v3586_v52 }
 0x532   : > { %v1416_v48 = vpop.permute.xlu1 %1415  ;;  %v3549_v44 = vpop.permute.xlu0 %1580 }
 0x533   : > { %4190 = vst [vmem:[#allocation7_spill] sm:$0xff] %v3549_v44 }
 0x534   : > { %1482 = vrot.lane.b32.xlu0 %v3432_v36, %s2513_s8  ;;  %1541 = vrot.lane.b32.xlu1 %v1292_v63, %s2514_s9 }
 0x536   : > { %v3554_v35 = vpop.permute.xlu1 %1692  ;;  %v3556_v55 = vpop.permute.xlu0 %1694 }
 0x538   : > { %1476 = vrot.lane.b32.xlu0 %v3438_v31, %s2513_s8  ;;  %1513 = vrot.lane.b32.xlu1 %v4191_v2, %s2514_s9 }
 0x53a   : > { %v3562_v15 = vpop.permute.xlu1 %1362  ;;  %v3564_v39 = vpop.permute.xlu0 %1364 }
 0x53c   : > { %1535 = vrot.lane.b32.xlu0 %v1286_v37, %s2514_s9  ;;  %1478 = vrot.lane.b32.xlu1 %v3414_v46, %s2513_s8 }
 0x53e   : > { %v3569_v58 = vpop.permute.xlu1 %1305  ;;  %v3571_v25 = vpop.permute.xlu0 %1635 }
 0x540   : > { %1539 = vrot.lane.b32.xlu0 %v1290_v40, %s2514_s9  ;;  %1533 = vrot.lane.b32.xlu1 %v1284_v13, %s2514_s9 }
 0x542   : > { %v3575_v8 = vpop.permute.xlu1 %1474  ;;  %v3577_v2 = vpop.permute.xlu0 %1584 }
 0x543   : > { %4192 = vst [vmem:[#allocation9_spill] sm:$0xff] %v3575_v8  ;;  %v3595_v8 = vld [vmem:[#allocation2 + $0x20] sm:$0xff] }
 0x544   : > { %1470 = vrot.lane.b32.xlu0 %v3390_v51, %s2513_s8  ;;  %1472 = vrot.lane.b32.xlu1 %v3409_v20, %s2513_s8  ;;  %4196 = vst [vmem:[#allocation27_spill] sm:$0xff] %v3595_v8 }
 0x546   : > { %v1703_v19 = vpop.permute.xlu1 %1702  ;;  %v3588_v9 = vpop.permute.xlu0 %1582 }
 0x547   : > { %4194 = vst [vmem:[#allocation25_spill] sm:$0xff] %v3588_v9 }
 0x548   : > { %1464 = vrot.lane.b32.xlu0 %v3591_v53, %s2513_s8  ;;  %1466 = vrot.lane.b32.xlu1 %v3595_v8, %s2513_s8  ;;  %v1749_v53 = vld [vmem:[%s4105_s4 + $0x8] sm:$0xff] }
 0x54a   : > { %v3599_v32 = vpop.permute.xlu1 %1366  ;;  %v1526_v33 = vpop.permute.xlu0 %1525 }
 0x54c   : > { %1431 = vrot.lane.b32.xlu0 %v1292_v63, %s2516_s11  ;;  %1460 = vrot.lane.b32.xlu1 %v3602_v16, %s2513_s8 }
 0x54e   : > { %v3606_v52 = vpop.permute.xlu1 %1586  ;;  %v1373_v44 = vpop.permute.xlu0 %1372 }
 0x54f   : > { %4198 = vst [vmem:[#allocation29_spill] sm:$0xff] %v3606_v52 }
 0x550   : > { %1425 = vrot.lane.b32.xlu0 %v1286_v37, %s2516_s11  ;;  %1429 = vrot.lane.b32.xlu1 %v1290_v40, %s2516_s11  ;;  %v1748_v40 = vld [vmem:[%s4105_s4] sm:$0xff] }
 0x552   : > { %v1418_v9 = vpop.permute.xlu1 %1417  ;;  %v3610_v49 = vpop.permute.xlu0 %1592 }
 0x553   : > { %4199 = vst [vmem:[#allocation30_spill] sm:$0xff] %v3610_v49 }
 0x554   : > { %1458 = vrot.lane.b32.xlu0 %v3612_v56, %s2513_s8  ;;  %1423 = vrot.lane.b32.xlu1 %v1284_v13, %s2516_s11  ;;  %v1437_v56 = vsel %vm336_vm11, %v1416_v48, %v1418_v9 }
 0x556   : > { %v3617_v63 = vpop.permute.xlu1 %1637  ;;  %v1697_v16 = vpop.permute.xlu0 %1696 }
 0x558   : > { %1427 = vrot.lane.b32.xlu0 %v3490_v14, %s2516_s11  ;;  %1752 = vperm.xlu1 %2489, %v1748_v40   ;;  %v1436_v14 = vsel %vm336_vm11, %v3374_v21, %v3372_v7 }
 0x55a   : > { %v3624_v37 = vpop.permute.xlu1 %1307  ;;  %v3626_v52 = vpop.permute.xlu0 %1419 }
 0x55b   : > { %v1438_v13 = vsel %vm336_vm11, %v1418_v9, %v3626_v52  ;;  %v1435_v9 = vsel %vm336_vm11, %v3308_v1, %v3374_v21 }
 0x55c   : > { %1421 = vrot.lane.b32.xlu0 %v3499_v17, %s2516_s11  ;;  %1773 = vmatprep.subr.mxu0 %v1438_v13 }
 0x55d   : > { %1774 = vmatpush1.msra.mxu0 %v1437_v56 }
 0x55e   : > { %v3639_v4 = vpop.permute.xlu1 %1706  ;;  %1775 = vmatprep.subr.mxu0 %v1436_v14  ;;  %v3641_v49 = vpop.permute.xlu0 %1639 }
 0x55f   : > { %4201 = vst [vmem:[#allocation32_spill] sm:$0xff] %v3639_v4  ;;  %1776 = vmatpush1.msra.mxu0 %v1435_v9 }
 0x560   : > { %1757 = vperm.xlu0 %2490, %v1749_v53  }
 0x562   : > { %v3646_v56 = vpop.permute.xlu1 %1376  ;;  %v3648_v17 = vpop.permute.xlu0 %1309 }
 0x566   : > { %v3650_v48 = vpop.permute.xlu1 %1596  ;;  %v3652_v40 = vpop.permute.xlu0 %1529 }
 0x567   : > { %4202 = vst [vmem:[#allocation33_spill] sm:$0xff] %v3652_v40  ;;  %v1434_v40 = vsel %vm336_vm11, %v3299_v3, %v3288_v27 }
 0x56a   : > { %v3654_v13 = vpop.permute.xlu1 %1486  ;;  %v3656_v8 = vpop.permute.xlu0 %1527 }
 0x56b   : > { %4203 = vst [vmem:[#allocation34_spill] sm:$0xff] %v3654_v13  ;;  %4204 = vst [vmem:[#allocation35_spill] sm:$0xff] %v3656_v8  ;;  %v3660_v14 = vsel %vm360_vm9, %v1526_v33, %v3656_v8  ;;  %v1433_v33 = vsel %vm336_vm11, %v3291_v61, %v3299_v3  ;;  %v1713_v3 = vsel %vm396_vm6, %v3554_v35, %v3556_v55 }
 0x56c   : > { %4205 = vst [vmem:[#allocation36_spill] sm:$0xff] %v3660_v14 }
 0x56e   : > { %v3662_v51 = vpop.permute.xlu1 %1700  ;;  %v1705_v1 = vpop.permute.xlu0 %1704 }
 0x56f   : > { %v1716_v53 = vsel %vm396_vm6, %v1703_v19, %v1705_v1  ;;  %v1717_v21 = vsel %vm396_vm6, %v1705_v1, %v3639_v4 }
 0x570   : > { %2363 = vmatprep.subr.msk.mxu1 %vm399_vm5, %v1717_v21 }
 0x571   : > { %2364 = vmatpush1.msk.msra.mxu1 %vm399_vm5, %v1716_v53 }
 0x572   : > { %v1369_v9 = vpop.permute.xlu1 %1368  ;;  %v1375_v13 = vpop.permute.xlu0 %1374 }
 0x573   : > { %v1386_v14 = vsel %vm324_vm12, %v1373_v44, %v1375_v13  ;;  %v1387_v19 = vsel %vm324_vm12, %v1375_v13, %v3646_v56  ;;  %v1712_v13 = vsel %vm396_vm6, %v3543_v29, %v3554_v35  ;;  %v1383_v29 = vsel %vm324_vm12, %v3562_v15, %v3564_v39 }
 0x574   : > { %v1734_v1 = vsel %vm399_vm5, %v1387_v19, %v1434_v40  ;;  %v1733_v21 = vsel %vm399_vm5, %v1386_v14, %v1433_v33  ;;  %v1384_v14 = vsel %vm324_vm12, %v3599_v32, %v1369_v9  ;;  %v1709_v35 = vsel %vm396_vm6, %v3318_v62, %v3330_v50 }
 0x575   : > { %1777 = vmatprep.subr.mxu0 %v1734_v1  ;;  %v1708_v33 = vsel %vm396_vm6, %v3334_v54, %v3318_v62  ;;  %v1382_v32 = vsel %vm324_vm12, %v3541_v43, %v3562_v15  ;;  %v1380_v19 = vsel %vm324_vm12, %v3324_v42, %v3310_v26  ;;  %v1379_v62 = vsel %vm324_vm12, %v3328_v11, %v3338_v24 }
 0x576   : > { %v1318_v53 = vpop.permute.xlu1 %1317  ;;  %1778 = vmatpush1.msra.mxu0 %v1733_v21  ;;  %v3680_v4 = vpop.permute.xlu0 %1594  ;;  %v1378_v15 = vsel %vm324_vm12, %v3332_v0, %v3328_v11 }
 0x57a   : > { %v3682_v8 = vpop.permute.xlu1 %1311  ;;  %v1699_v38 = vpop.permute.xlu0 %1698 }
 0x57b   : > { %v1714_v20 = vsel %vm396_vm6, %v1697_v16, %v1699_v38  ;;  %v1715_v61 = vsel %vm396_vm6, %v1699_v38, %v3662_v51  ;;  %v1711_v38 = vsel %vm396_vm6, %v3301_v12, %v3316_v60 }
 0x57c   : > { %1866 = vmatprep.subr.mxu1 %v1715_v61 }
 0x57d   : > { %1867 = vmatpush1.msra.mxu1 %v1714_v20  ;;  %v1710_v20 = vsel %vm396_vm6, %v3322_v10, %v3301_v12  ;;  %vm1760_vm6 = vcmask 556032  }
 0x57e   : > { %v3690_v44 = vpop.permute.xlu1 %1590  ;;  %1868 = vmatprep.subr.mxu1 %v1713_v3  ;;  %v3692_v40 = vpop.permute.xlu0 %1370 }
 0x57f   : > { %1869 = vmatpush1.msra.mxu1 %v1712_v13  ;;  %v1385_v16 = vsel %vm324_vm12, %v1369_v9, %v3692_v40  ;;  %v1381_v9 = vsel %vm324_vm12, %v3310_v26, %v3326_v57 }
 0x580   : > { %1779 = vmatprep.subr.mxu0 %v1385_v16  ;;  %1870 = vmatprep.subr.mxu1 %v1711_v38 }
 0x581   : > { %1780 = vmatpush1.msra.mxu0 %v1384_v14  ;;  %1871 = vmatpush1.msra.mxu1 %v1710_v20 }
 0x582   : > { %v3716_v12 = vpop.permute.xlu1 %1588  ;;  %1781 = vmatprep.subr.mxu0 %v1383_v29  ;;  %1872 = vmatprep.subr.mxu1 %v1709_v35  ;;  %v1648_v10 = vpop.permute.xlu0 %1647 }
 0x583   : > { %1782 = vmatpush1.msra.mxu0 %v1382_v32  ;;  %1873 = vmatpush1.msra.mxu1 %v1708_v33 }
 0x584   : > { %1783 = vmatprep.subr.mxu0 %v1381_v9 }
 0x585   : > { %1784 = vmatpush1.msra.mxu0 %v1380_v19 }
 0x586   : > { %v3733_v54 = vpop.permute.xlu1 %1531  ;;  %1785 = vmatprep.subr.mxu0 %v1379_v62  ;;  %v1642_v43 = vpop.permute.xlu0 %1641  ;;  %v1656_v62 = vsel %vm384_vm8, %v3376_v47, %v3378_v34 }
 0x587   : > { %1786 = vmatpush1.msra.mxu0 %v1378_v15 }
 0x58a   : > { %v1650_v1 = vpop.permute.xlu1 %1649  ;;  %v3735_v21 = vpop.permute.xlu0 %1480 }
 0x58b   : > { %v1661_v16 = vsel %vm384_vm8, %v1648_v10, %v1650_v1  ;;  %v1658_v10 = vsel %vm384_vm8, %v3617_v63, %v3641_v49 }
 0x58e   : > { %v1320_v61 = vpop.permute.xlu1 %1319  ;;  %v3737_v26 = vpop.permute.xlu0 %1537 }
 0x58f   : > { %v1331_v20 = vsel %vm312_vm13, %v1318_v53, %v1320_v61  ;;  %v1657_v53 = vsel %vm384_vm8, %v3571_v25, %v3617_v63  ;;  %v1655_v25 = vsel %vm384_vm8, %v3342_v59, %v3376_v47  ;;  %v3779_v63 = vld [vmem:[%s4104_s3 + $0x10] sm:$0xff]  ;;  %v1327_v59 = vsel %vm312_vm13, %v3569_v58, %v3624_v37 }
 0x590   : > { %v1325_v58 = vsel %vm312_vm13, %v3340_v45, %v3380_v18 }
 0x592   : > { %v1644_v42 = vpop.permute.xlu1 %1643  ;;  %v3739_v3 = vpop.permute.xlu0 %1651 }
 0x593   : > { %v1662_v13 = vsel %vm384_vm8, %v1650_v1, %v3739_v3  ;;  %v1659_v33 = vsel %vm384_vm8, %v1642_v43, %v1644_v42  ;;  %v1328_v43 = vsel %vm312_vm13, %v3624_v37, %v3648_v17  ;;  %v1323_v37 = vsel %vm312_vm13, %v3354_v41, %v3336_v22 }
 0x594   : > { %1874 = vmatprep.subr.mxu1 %v1662_v13  ;;  %v1730_v45 = vsel %vm399_vm5, %v3432_v36, %v1323_v37  ;;  %v4207_v36 = vld [vmem:[#allocation15_spill] sm:$0xff] }
 0x595   : > { %1875 = vmatpush1.msra.mxu1 %v1661_v16 }
 0x596   : > { %v1314_v11 = vpop.permute.xlu1 %1313  ;;  %v3744_v0 = vpop.permute.xlu0 %1321 }
 0x597   : > { %v1332_v38 = vsel %vm312_vm13, %v1320_v61, %v3744_v0  ;;  %v1329_v15 = vsel %vm312_vm13, %v3682_v8, %v1314_v11  ;;  %v1741_v8 = vsel %vm399_vm5, %v3650_v48, %v3346_v23  ;;  %v1326_v61 = vsel %vm312_vm13, %v3380_v18, %v3382_v5 }
 0x598   : > { %1787 = vmatprep.subr.mxu0 %v1332_v38  ;;  %v4211_v38 = vld [vmem:[#allocation26_spill] sm:$0xff] }
 0x599   : > { %1788 = vmatpush1.msra.mxu0 %v1331_v20  ;;  %v4212_v20 = vld [vmem:[#allocation12_spill] sm:$0xff] }
 0x59a   : > { %v3749_v14 = vpop.permute.xlu1 %1521  ;;  %v3751_v29 = vpop.permute.xlu0 %1645 }
 0x59b   : > { %v1660_v35 = vsel %vm384_vm8, %v1644_v42, %v3751_v29  ;;  %v1324_v42 = vsel %vm312_vm13, %v3336_v22, %v3350_v30  ;;  %v1735_v22 = vsel %vm399_vm5, %v3646_v56, %v3288_v27  ;;  %v4208_v27 = vld [vmem:[#allocation23_spill] sm:$0xff] }
 0x59c   : > { %1876 = vmatprep.subr.mxu1 %v1660_v35  ;;  %v1731_v13 = vsel %vm399_vm5, %v3477_v6, %v1324_v42  ;;  %v1607_v6 = vsel %vm372_vm7, %v3680_v4, %v3650_v48  ;;  %v4209_v56 = vld [vmem:[#allocation27_spill] sm:$0xff]  ;;  %v1654_v35 = vsel %vm384_vm8, %v4212_v20, %v3346_v23  ;;  %v4213_v48 = vld [vmem:[#allocation28_spill] sm:$0xff] }
 0x59d   : > { %1877 = vmatpush1.msra.mxu1 %v1659_v33 }
 0x59e   : > { %v3762_v32 = vpop.permute.xlu1 %1484  ;;  %1878 = vmatprep.subr.mxu1 %v1658_v10  ;;  %v3764_v9 = vpop.permute.xlu0 %1315  ;;  %v4214_v10 = vld [vmem:[#allocation13_spill] sm:$0xff] }
 0x59f   : > { %1879 = vmatpush1.msra.mxu1 %v1657_v53  ;;  %v1330_v19 = vsel %vm312_vm13, %v1314_v11, %v3764_v9  ;;  %v1653_v53 = vsel %vm384_vm8, %v4214_v10, %v4212_v20 }
 0x5a0   : > { %1789 = vmatprep.subr.mxu0 %v1330_v19  ;;  %1880 = vmatprep.subr.mxu1 %v1656_v62  ;;  %v1740_v19 = vsel %vm399_vm5, %v1607_v6, %v1654_v35  ;;  %v1605_v62 = vsel %vm372_vm7, %v3716_v12, %v3690_v44 }
 0x5a1   : > { %1790 = vmatpush1.msra.mxu0 %v1329_v15  ;;  %1881 = vmatpush1.msra.mxu1 %v1655_v25  ;;  %v4217_v15 = vld [vmem:[#allocation29_spill] sm:$0xff] }
 0x5a2   : > { %v3790_v47 = vpop.permute.xlu1 %1519  ;;  %1791 = vmatprep.subr.mxu0 %v1328_v43  ;;  %2379 = vmatprep.subr.mxu1 %v1741_v8  ;;  %v3792_v1 = vpop.permute.xlu0 %1515  ;;  %v1604_v25 = vsel %vm372_vm7, %v4217_v15, %v3716_v12  ;;  %v4221_v12 = vld [vmem:[#allocation17_spill] sm:$0xff]  ;;  %v3925_v15 = vld [vmem:[%s4104_s3 + $0x28] sm:$0xff] }
 0x5a3   : > { %1792 = vmatpush1.msra.mxu0 %v1327_v59  ;;  %2365 = vmatmul.mubr.msk.f32.vlgmr.msra.gmra.mxu1 %vm1760_vm6, %v3779_v63  ;;  %v4219_v59 = vld [vmem:[#allocation25_spill] sm:$0xff] }
 0x5a4   : > { %2380 = vmatpush3.msra.mxu1 %v3626_v52  ;;  %1793 = vmatprep.subr.mxu0 %v1326_v61  ;;  %v1603_v61 = vsel %vm372_vm7, %v4219_v59, %v3577_v2 }
 0x5a5   : > { %2381 = vmatprep.subr.mxu1 %v3690_v44  ;;  %1794 = vmatpush1.msra.mxu0 %v1325_v58  ;;  %v4220_v44 = vld [vmem:[#allocation7_spill] sm:$0xff]  ;;  %v4222_v58 = vld [vmem:[#allocation34_spill] sm:$0xff] }
 0x5a6   : > { %2382 = vmatpush3.msra.mxu1 %v3372_v7  ;;  %v3813_v16 = vpop.permute.xlu1 %1541  ;;  %1795 = vmatprep.subr.mxu0 %v1731_v13  ;;  %v3815_v52 = vpop.permute.xlu0 %1482  ;;  %v4206_v7 = vld [vmem:[#allocation8_spill] sm:$0xff]  ;;  %v1602_v42 = vsel %vm372_vm7, %v4220_v44, %v4219_v59  ;;  %v1738_v37 = vsel %vm399_vm5, %v4222_v58, %v4221_v12  ;;  %v1742_v44 = vld [vmem:[%s4104_s3] sm:$0xff] }
 0x5a7   : > { %2383 = vmatprep.subr.mxu1 %v3577_v2  ;;  %1796 = vmatpush1.msra.mxu0 %v1730_v45  ;;  %v4224_v45 = vld [vmem:[#allocation19_spill] sm:$0xff] }
 0x5a8   : > { %2384 = vmatpush3.msra.mxu1 %v1735_v22  ;;  %1797 = vmatprep.subr.mxu0 %v3414_v46 }
 0x5a9   : > { %2385 = vmatprep.subr.mxu1 %v3344_v28  ;;  %1798 = vmatpush1.msra.mxu0 %v3438_v31 }
 0x5aa   : > { %2386 = vmatpush3.msra.mxu1 %v3692_v40  ;;  %v3827_v41 = vpop.permute.xlu1 %1513  ;;  %1799 = vmatprep.subr.mxu0 %v4206_v7  ;;  %v3830_v18 = vpop.permute.xlu0 %1476  ;;  %v4210_v40 = vld [vmem:[#allocation30_spill] sm:$0xff] }
 0x5ab   : > { %2387 = vmatprep.subr.mxu1 %v4207_v36  ;;  %1800 = vmatpush1.msra.mxu0 %v4208_v27  ;;  %v1606_v11 = vsel %vm372_vm7, %v4210_v40, %v3680_v4  ;;  %v4215_v4 = vld [vmem:[#allocation31_spill] sm:$0xff]  ;;  %v4225_v27 = vld [vmem:[#allocation16_spill] sm:$0xff]  ;;  %v4227_v40 = vld [vmem:[#allocation9_spill] sm:$0xff] }
 0x5ac   : > { %2388 = vmatpush3.msra.mxu1 %v3564_v39  ;;  %1801 = vmatprep.subr.mxu0 %v4209_v56  ;;  %v1739_v23 = vsel %vm399_vm5, %v1606_v11, %v1653_v53  ;;  %v1599_v6 = vsel %vm372_vm7, %v4225_v27, %v4207_v36  ;;  %v4226_v56 = vld [vmem:[#allocation18_spill] sm:$0xff] }
 0x5ad   : > { %2389 = vmatprep.subr.mxu1 %v3813_v16  ;;  %1802 = vmatpush1.msra.mxu0 %v4211_v38  ;;  %v4228_v11 = vld [vmem:[#allocation10_spill] sm:$0xff] }
 0x5ae   : > { %2390 = vmatpush3.msra.mxu1 %v3326_v57  ;;  %v3848_v33 = vpop.permute.xlu1 %1478  ;;  %1803 = vmatprep.subr.mxu0 %v4213_v48  ;;  %v1536_v39 = vpop.permute.xlu0 %1535  ;;  %v4216_v57 = vld [vmem:[#allocation33_spill] sm:$0xff]  ;;  %v1732_v38 = vsel %vm399_vm5, %v4228_v11, %v3350_v30  ;;  %v4231_v30 = vld [vmem:[#allocation20_spill] sm:$0xff] }
 0x5af   : > { %1804 = vmatpush1.msra.mxu0 %v4215_v4  ;;  %2391 = vmatprep.subr.mxu1 %v1536_v39  ;;  %v4229_v48 = vld [vmem:[#allocation21_spill] sm:$0xff]  ;;  %v1544_v4 = vsel %vm360_vm9, %v3792_v1, %v4221_v12 }
 0x5b0   : > { %1805 = vmatprep.subr.mxu0 %v1740_v19  ;;  %2392 = vmatpush3.msra.mxu1 %v3338_v24  ;;  %v4218_v24 = vld [vmem:[#allocation22_spill] sm:$0xff] }
 0x5b1   : > { %1806 = vmatpush2.msra.mxu0 %v1739_v23  ;;  %2393 = vmatprep.subr.mxu1 %v4216_v57 }
 0x5b2   : > { %v1534_v43 = vpop.permute.xlu1 %1533  ;;  %1807 = vmatprep.subr.mxu0 %v1605_v62  ;;  %2394 = vmatpush3.msra.mxu1 %v3744_v0  ;;  %v1540_v8 = vpop.permute.xlu0 %1539  ;;  %v4223_v0 = vld [vmem:[#allocation14_spill] sm:$0xff]  ;;  %v4234_v62 = vld [vmem:[#allocation36_spill] sm:$0xff] }
 0x5b3   : > { %1808 = vmatpush2.msra.mxu0 %v1604_v25  ;;  %2395 = vmatprep.subr.mxu1 %v4218_v24  ;;  %v1601_v13 = vsel %vm372_vm7, %v4223_v0, %v3344_v28  ;;  %v1600_v2 = vsel %vm372_vm7, %v4224_v45, %v4223_v0  ;;  %v1598_v28 = vsel %vm372_vm7, %v4226_v56, %v4225_v27  ;;  %v1746_v27 = vld [vmem:[%s4104_s3 + $0x20] sm:$0xff] }
 0x5b4   : > { %1809 = vmatprep.subr.mxu0 %v1603_v61  ;;  %2396 = vmatpush3.msra.mxu1 %v3764_v9  ;;  %v1551_v36 = vsel %vm360_vm9, %v3737_v26, %v1540_v8  ;;  %v1549_v10 = vsel %vm360_vm9, %v3733_v54, %v1534_v43  ;;  %v4232_v26 = vld [vmem:[#allocation35_spill] sm:$0xff]  ;;  %v1543_v54 = vsel %vm360_vm9, %v3827_v41, %v3792_v1 }
 0x5b5   : > { %1810 = vmatpush2.msra.mxu0 %v1602_v42  ;;  %2397 = vmatprep.subr.mxu1 %v1738_v37  ;;  %v1548_v53 = vsel %vm360_vm9, %v4232_v26, %v4216_v57  ;;  %v1546_v57 = vsel %vm360_vm9, %v3749_v14, %v4218_v24  ;;  %v1497_v25 = vsel %vm348_vm10, %v3762_v32, %v4222_v58  ;;  %v2497_v41 = vld [vmem:[#allocation2 + $0x28] sm:$0xff]  ;;  %v4235_v42 = vld [vmem:[#allocation6_spill] sm:$0xff]  ;;  %v4236_v58 = vld [vmem:[#allocation32_spill] sm:$0xff] }
 0x5b6   : > { %v3883_v22 = vpop.permute.xlu1 %1472  ;;  %1811 = vmatprep.subr.mxu0 %v1601_v13  ;;  %2398 = vmatpush3.msra.mxu1 %v3648_v17  ;;  %v1471_v9 = vpop.permute.xlu0 %1470  ;;  %v1552_v17 = vsel %vm360_vm9, %v1540_v8, %v3813_v16  ;;  %v4230_v16 = vld [vmem:[#allocation11_spill] sm:$0xff]  ;;  %v1545_v1 = vsel %vm360_vm9, %v3790_v47, %v3749_v14  ;;  %v2498_v8 = vld [vmem:[#allocation2 + $0x78] sm:$0xff]  ;;  %v1737_v24 = vsel %vm399_vm5, %v1497_v25, %v1544_v4 }
 0x5b7   : > { %1812 = vmatpush2.msra.mxu0 %v1600_v2  ;;  %2399 = vmatprep.subr.mxu1 %v3735_v21  ;;  %v1495_v14 = vsel %vm348_vm10, %v3848_v33, %v3735_v21  ;;  %v1493_v12 = vsel %vm348_vm10, %v3883_v22, %v4227_v40  ;;  %v1492_v21 = vsel %vm348_vm10, %v1471_v9, %v3883_v22 }
 0x5b8   : > { %1813 = vmatprep.subr.mxu0 %v1599_v6  ;;  %2400 = vmatpush3.msra.mxu1 %v3382_v5  ;;  %v1550_v5 = vsel %vm360_vm9, %v1534_v43, %v1536_v39  ;;  %v4233_v39 = vld [vmem:[#allocation24_spill] sm:$0xff]  ;;  %v1496_v43 = vsel %vm348_vm10, %v3815_v52, %v3762_v32  ;;  %v1494_v32 = vsel %vm348_vm10, %v3830_v18, %v3848_v33 }
 0x5b9   : > { %1814 = vmatpush2.msra.mxu0 %v1598_v28  ;;  %2401 = vmatprep.subr.mxu1 %v4227_v40  ;;  %v1736_v61 = vsel %vm399_vm5, %v1496_v43, %v1543_v54  ;;  %v2499_v52 = vld [vmem:[#allocation2 + $0x10] sm:$0xff]  ;;  %v4238_v43 = vld [vmem:[#allocation5_spill] sm:$0xff] }
 0x5ba   : > { %v1467_v20 = vpop.permute.xlu1 %1466  ;;  %1815 = vmatprep.subr.mxu0 %v1552_v17  ;;  %2402 = vmatpush3.msra.mxu1 %v1732_v38  ;;  %v1465_v35 = vpop.permute.xlu0 %1464 }
 0x5bb   : > { %1816 = vmatpush2.msra.mxu0 %v1551_v36  ;;  %2403 = vmatprep.subr.mxu1 %v4229_v48  ;;  %v1491_v33 = vsel %vm348_vm10, %v1467_v20, %v4229_v48  ;;  %v1490_v37 = vsel %vm348_vm10, %v1465_v35, %v1467_v20 }
 0x5bc   : > { %1817 = vmatprep.subr.mxu0 %v1550_v5  ;;  %2404 = vmatpush3.msra.mxu1 %v4230_v16 }
 0x5bd   : > { %1818 = vmatpush2.msra.mxu0 %v1549_v10  ;;  %2405 = vmatprep.subr.mxu1 %v4231_v30 }
 0x5be   : > { %v1461_v19 = vpop.permute.xlu1 %1460  ;;  %1819 = vmatprep.subr.mxu0 %v1548_v53  ;;  %2406 = vmatpush3.msra.mxu1 %v4233_v39  ;;  %v1432_v23 = vpop.permute.xlu0 %1431 }
 0x5bf   : > { %1820 = vmatpush2.msra.mxu0 %v4234_v62  ;;  %2407 = vmatprep.subr.mxu1 %v1432_v23  ;;  %v1489_v0 = vsel %vm348_vm10, %v1461_v19, %v4231_v30 }
 0x5c0   : > { %1821 = vmatprep.subr.mxu0 %v1546_v57  ;;  %2408 = vmatpush3.msra.mxu1 %v2497_v41 }
 0x5c1   : > { %1822 = vmatpush2.msra.mxu0 %v1545_v1  ;;  %1920 = vmatprep.mubr.f32.mxu1 %v2498_v8 }
 0x5c2   : > { %1823 = vmatprep.subr.mxu0 %v1737_v24  ;;  %2366 = vmatmul.mubr.msk.f32.gmra.mxu1 %vm1760_vm6, %v3925_v15  ;;  %v1426_v59 = vpop.permute.xlu0 %1425  ;;  %v1430_v47 = vpop.permute.xlu1 %1429 }
 0x5c3   : > { %1824 = vmatpush2.msra.mxu0 %v1736_v61  ;;  %2409 = vmatprep.subr.mxu1 %v1426_v59  ;;  %v1442_v9 = vsel %vm336_vm11, %v1430_v47, %v1432_v23 }
 0x5c4   : > { %1825 = vmatprep.subr.mxu0 %v1495_v14  ;;  %2410 = vmatpush3.msra.mxu1 %v2499_v52 }
 0x5c5   : > { %1826 = vmatpush2.msra.mxu0 %v1494_v32  ;;  %1991 = vmatprep.mubr.f32.mxu1 %v4235_v42 }
 0x5c6   : > { %2441 = vmatprep.subr.msk.mxu1 %vm399_vm5, %v4236_v58  ;;  %1827 = vmatprep.subr.mxu0 %v1493_v12  ;;  %v1459_v18 = vpop.permute.xlu0 %1458  ;;  %v1424_v13 = vpop.permute.xlu1 %1423 }
 0x5c7   : > { %1992 = vmatmul.mubr.f32.vlgmr.msra.gmra.mxu1 %v1742_v44  ;;  %1828 = vmatpush2.msra.mxu0 %v1492_v21  ;;  %v1488_v45 = vsel %vm348_vm10, %v1459_v18, %v1461_v19  ;;  %v4237_v19 = vld [vmem:[#allocation4_spill] sm:$0xff]  ;;  %v4239_v18 = vld [vmem:[#allocation3_spill] sm:$0xff] }
 0x5c8   : > { %2442 = vmatpush3.msk.msra.mxu1 %vm399_vm5, %v4236_v58  ;;  %1829 = vmatprep.subr.mxu0 %v1491_v33 }
 0x5c9   : > { %2443 = vmatprep.subr.mxu1 %v3662_v51  ;;  %1830 = vmatpush2.msra.mxu0 %v1490_v37 }
 0x5ca   : > { %2444 = vmatpush3.msra.mxu1 %v3662_v51  ;;  %1831 = vmatprep.subr.mxu0 %v1489_v0  ;;  %v1428_v2 = vpop.permute.xlu0 %1427  ;;  %v1440_v51 = vsel %vm336_vm11, %v1424_v13, %v1426_v59 }
 0x5cb   : > { %2445 = vmatprep.subr.mxu1 %v3556_v55  ;;  %v1441_v22 = vsel %vm336_vm11, %v1428_v2, %v1430_v47  ;;  %1832 = vmatpush2.msra.mxu0 %v1488_v45 }
 0x5cc   : > { %2446 = vmatpush3.msra.mxu1 %v3556_v55  ;;  %1833 = vmatprep.subr.mxu0 %v1442_v9  ;;  %v1745_v55 = vld [vmem:[%s4104_s3 + $0x18] sm:$0xff] }
 0x5cd   : > { %2447 = vmatprep.subr.mxu1 %v3316_v60  ;;  %1834 = vmatpush2.msra.mxu0 %v1441_v22 }
 0x5ce   : > { %2448 = vmatpush3.msra.mxu1 %v3316_v60  ;;  %1835 = vmatprep.subr.mxu0 %v1440_v51  ;;  %v1422_v6 = vpop.permute.xlu0 %1421  ;;  %v2146_v51 = vld [vmem:[#allocation2] sm:$0xff] }
 0x5cf   : > { %2449 = vmatprep.subr.mxu1 %v3330_v50  ;;  %v1439_v56 = vsel %vm336_vm11, %v1422_v6, %v1424_v13  ;;  %1996 = vmatprep.mubr.f32.mxu1 %v1746_v27  ;;  %v2149_v6 = vld [vmem:[#allocation2 + $0x18] sm:$0xff] }
 0x5d0   : > { %2450 = vmatpush3.msra.mxu1 %v3330_v50  ;;  %1836 = vmatpush2.msra.mxu0 %v1439_v56  ;;  %v2148_v56 = vld [vmem:[#allocation2 + $0x10] sm:$0xff] }
 0x5d1   : > { %2451 = vmatprep.subr.mxu1 %v3739_v3  ;;  %1838 = vmatmul.mubr.f32.vlgmr.msra.gmra.mxu0 %v1742_v44 }
 0x5d2   : > { %2452 = vmatpush3.msra.mxu1 %v3739_v3  ;;  %1843 = vmatprep.mubr.f32.mxu0 %v1746_v27  ;;  %v2147_v27 = vld [vmem:[#allocation2 + $0x8] sm:$0xff] }
 0x5d3   : > { %1997 = vmatmul.mubr.f32.gmra.mxu1 %v1745_v55  ;;  %2453 = vmatprep.subr.mxu1 %v3751_v29  ;;  %v1753_v40 = vpop.permute.xlu1 %1752 }
 0x5d4   : > { %2454 = vmatpush3.msra.mxu1 %v3751_v29  ;;  %2459 = vmatprep.mubr.msk.f32.mxu1 %vm1760_vm6, %v3779_v63 }
 0x5d5   : > { %2455 = vmatprep.subr.mxu1 %v3641_v49  ;;  %1844 = vmatmul.mubr.f32.gmra.mxu0 %v1745_v55  ;;  %v2151_v55 = vld [vmem:[#allocation2 + $0x28] sm:$0xff] }
 0x5d6   : > { %2456 = vmatpush3.msra.mxu1 %v3641_v49 }
 0x5d7   : > { %2457 = vmatprep.subr.mxu1 %v3378_v34 }
 0x5d8   : > { %2458 = vmatpush3.msra.mxu1 %v3378_v34 }
 0x5d9   : > { %2460 = vmatmul.mubr.msk.f32.vlgmr.msra.gmra.mxu1 %vm1760_vm6, %v3925_v15 }
 0x5db   : > { %v1758_v38 = vpop.permute.xlu0 %1757 }
 0x663   : > { %v1916_v60 = vpop.f32.mrf.mxu1 }
 0x665   : > { %v1918_v50 = vpop.f32.mrf.mxu1 }
 0x682   : > { %v1922_v3 = vpop.f32.mrf.mxu1 }
 0x684   : > { %v1924_v28 = vpop.f32.mrf.mxu1 }
 0x687   : > { %v2411_v29 = vpop.f32.mrf.mxu1 }
 0x689   : > { %v2412_v17 = vpop.f32.mrf.mxu1 }
 0x68a   : > { %v2413_v48 = vadd.f32 %v2412_v17, %v2411_v29 }
 0x68c   : > { %v1994_v1 = vadd.f32 %v2413_v48, %v1753_v40 }
 0x691   : > { %v1839_v63 = vpop.f32.mrf.mxu0 }
 0x692   : > { %v1840_v11 = vadd.f32 %v1839_v63, %v1753_v40 }
 0x693   : > { %v2414_v36 = vpop.f32.mrf.mxu1  ;;  %v1841_v20 = vpop.f32.mrf.mxu0 }
 0x694   : > { %v1917_v49 = vadd.f32 %v1916_v60, %v1840_v11  ;;  %v1842_v35 = vadd.f32 %v1841_v20, %v1753_v40  ;;  %v2150_v60 = vld [vmem:[#allocation2 + $0x20] sm:$0xff] }
 0x695   : > { %v2415_v5 = vpop.f32.mrf.mxu1  ;;  %v1845_v34 = vpop.f32.mrf.mxu0 }
 0x696   : > { %v2077_v10 = vmax.f32 %v1917_v49, 0.0  ;;  %v1919_v30 = vadd.f32 %v1918_v50, %v1842_v35  ;;  %v2416_v26 = vadd.f32 %v2415_v5, %v2414_v36  ;;  %v1846_v53 = vadd.f32 %v1845_v34, %v1758_v38  ;;  %v2152_v50 = vld [vmem:[#allocation2 + $0x30] sm:$0xff] }
 0x697   : > { %v1847_v4 = vpop.f32.mrf.mxu0 }
 0x698   : > { %v2083_v23 = vmul.f32 %v2077_v10, %v4237_v19  ;;  %v2078_v54 = vmax.f32 %v1919_v30, 0.0  ;;  %v1923_v62 = vadd.f32 %v1922_v3, %v1846_v53  ;;  %v1848_v57 = vadd.f32 %v1847_v4, %v1758_v38 }
 0x699   : > { %v1999_v15 = vadd.f32 %v2416_v26, %v1758_v38  ;;  %v2461_v25 = vpop.f32.mrf.mxu1 }
 0x69a   : > { %v2095_v41 = vrot.slane %v2083_v23, 4  ;;  %v2084_v8 = vmul.f32 %v2078_v54, %v4238_v43  ;;  %v2080_v24 = vmax.f32 %v1923_v62, 0.0  ;;  %v1925_v59 = vadd.f32 %v1924_v28, %v1848_v57 }
 0x69b   : > { %v2074_v61 = vadd.f32 %v2461_v25, %v1999_v15  ;;  %v2068_v14 = vpop.f32.mrf.mxu1 }
 0x69c   : > { %v2081_v32 = vmax.f32 %v1925_v59, 0.0  ;;  %v2069_v47 = vadd.f32 %v2068_v14, %v1994_v1  ;;  %2104 = vrot.lane.b32.xlu1 %v2095_v41, %s2509_s28  ;;  %v2086_v52 = vmul.f32 %v2080_v24, %v4237_v19  ;;  %v2096_v42 = vrot.slane %v2084_v8, 4 }
 0x69d   : > { %v2082_v44 = vmax.f32 %v2074_v61, 0.0 }
 0x69e   : > { %v2079_v12 = vmax.f32 %v2069_v47, 0.0  ;;  %v2098_v21 = vrot.slane %v2086_v52, 4  ;;  %v2087_v58 = vmul.f32 %v2081_v32, %v4238_v43 }
 0x69f   : > { %v2088_v37 = vmul.f32 %v2082_v44, %v4239_v18 }
 0x6a0   : > { %v2085_v33 = vmul.f32 %v2079_v12, %v4239_v18  ;;  %2106 = vrot.lane.b32.xlu1 %v2096_v42, %s2509_s28  ;;  %2116 = vrot.lane.b32.xlu0 %v2098_v21, %s2509_s28  ;;  %v2100_v13 = vrot.slane %v2087_v58, 4  ;;  %v2099_v45 = vsel %vm399_vm5, %v2095_v41, %v2098_v21 }
 0x6a1   : > { %v2102_v2 = vrot.slane %v2088_v37, 4 }
 0x6a2   : > { %v2097_v0 = vrot.slane %v2085_v33, 4  ;;  %v2101_v22 = vsel %vm399_vm5, %v2096_v42, %v2100_v13 }
 0x6a4   : > { %2108 = vrot.lane.b32.xlu0 %v2097_v0, %s2509_s28  ;;  %2110 = vrot.lane.b32.xlu1 %v2099_v45, %s2509_s28  ;;  %v2103_v9 = vsel %vm399_vm5, %v2097_v0, %v2102_v2 }
 0x6a8   : > { %2112 = vrot.lane.b32.xlu0 %v2101_v22, %s2509_s28  ;;  %2114 = vrot.lane.b32.xlu1 %v2103_v9, %s2509_s28 }
 0x6ac   : > { %2120 = vrot.lane.b32.xlu0 %v2102_v2, %s2509_s28  ;;  %2118 = vrot.lane.b32.xlu1 %v2100_v13, %s2509_s28  ;;  %s2463_s28 = smul.u32 168, %s4242_s22 }
 0x6ae   : > { %s4051_s16 = scalar_lea.vmem %s4107_s6, %s2463_s28 }
 0x6b0   : > { %2190 = vrot.lane.b32.xlu0 %v2147_v27, %s2513_s8  ;;  %2188 = vrot.lane.b32.xlu1 %v2146_v51, %s2513_s8 }
 0x6b4   : > { %2194 = vrot.lane.b32.xlu0 %v2149_v6, %s2513_s8  ;;  %2192 = vrot.lane.b32.xlu1 %v2148_v56, %s2513_s8 }
 0x6b8   : > { %2198 = vrot.lane.b32.xlu0 %v2151_v55, %s2513_s8  ;;  %2196 = vrot.lane.b32.xlu1 %v2150_v60, %s2513_s8 }
 0x6bc   : > { %2202 = vrot.lane.b32.xlu0 %v4206_v7, %s2513_s8  ;;  %2200 = vrot.lane.b32.xlu1 %v2152_v50, %s2513_s8 }
 0x6c0   : > { %2206 = vrot.lane.b32.xlu0 %v3438_v31, %s2513_s8  ;;  %2204 = vrot.lane.b32.xlu1 %v4233_v39, %s2513_s8 }
 0x6c4   : > { %2210 = vrot.lane.b32.xlu0 %v4230_v16, %s2513_s8  ;;  %2208 = vrot.lane.b32.xlu1 %v3414_v46, %s2513_s8 }
 0x70e   : > { %v2105_v3 = vpop.permute.xlu1 %2104 }
 0x70f   : > { %2137 = vst.msk [vmem:[#allocation2 + $0x60] sm:$0xf0] %vm667_vm14, %v2105_v3 }
 0x712   : > { %v2107_v28 = vpop.permute.xlu1 %2106  ;;  %v2117_v29 = vpop.permute.xlu0 %2116 }
 0x713   : > { %v2122_v7 = vsel %vm285_vm2, %v2105_v3, %v2107_v28  ;;  %2143 = vst.msk [vmem:[#allocation2 + $0x90] sm:$0xf] %vm291_vm1, %v2117_v29  ;;  %vm4240_vm1 = vmmov %vm4183_vm4 }
 0x714   : > { %2138 = vst [vmem:[#allocation2 + $0x68] sm:$0xf0] %v2122_v7 }
 0x716   : > { %v2109_v31 = vpop.permute.xlu0 %2108  ;;  %v2111_v40 = vpop.permute.xlu1 %2110  ;;  %v2158_v39 = vld [vmem:[#allocation2 + $0x60] sm:$0xff] }
 0x717   : > { %v2123_v17 = vsel %vm285_vm2, %v2107_v28, %v2109_v31  ;;  %2140 = vst.msk [vmem:[#allocation2 + $0x78] sm:$0xff] %vm672_vm0, %v2111_v40  ;;  %2212 = vrot.lane.b32.xlu1 %v2158_v39, %s2513_s8 }
 0x718   : > { %2139 = vst.msk [vmem:[#allocation2 + $0x70] sm:$0xf0] %vm670_vm15, %v2123_v17 }
 0x71a   : > { %v2113_v46 = vpop.permute.xlu0 %2112  ;;  %v2115_v16 = vpop.permute.xlu1 %2114  ;;  %v2164_v63 = vld [vmem:[#allocation2 + $0x90] sm:$0xf] }
 0x71b   : > { %v2124_v11 = vsel %vm285_vm2, %v2111_v40, %v2113_v46  ;;  %v2125_v38 = vsel %vm285_vm2, %v2113_v46, %v2115_v16  ;;  %2224 = vrot.lane.b32.xlu1 %v2164_v63, %s2513_s8  ;;  %v2159_v36 = vld [vmem:[#allocation2 + $0x68] sm:$0xff] }
 0x71c   : > { %2142 = vst.msk [vmem:[#allocation2 + $0x88] sm:$0xff] %vm4240_vm1, %v2125_v38  ;;  %2214 = vrot.lane.b32.xlu0 %v2159_v36, %s2513_s8 }
 0x71e   : > { %v2121_v20 = vpop.permute.xlu0 %2120  ;;  %v2119_v49 = vpop.permute.xlu1 %2118  ;;  %v2161_v35 = vld [vmem:[#allocation2 + $0x78] sm:$0xff] }
 0x71f   : > { %v2126_v48 = vsel %vm285_vm2, %v2117_v29, %v2119_v49  ;;  %v2127_v5 = vsel %vm285_vm2, %v2119_v49, %v2121_v20  ;;  %v2160_v34 = vld [vmem:[#allocation2 + $0x70] sm:$0xff]  ;;  %vm2285_vm2 = vcmask 551936  }
 0x720   : > { %2144 = vst [vmem:[#allocation2 + $0x98] sm:$0xf] %v2126_v48  ;;  %2145 = vst.msk [vmem:[#allocation2 + $0xa0] sm:$0xf] %vm294_vm3, %v2127_v5  ;;  %2216 = vrot.lane.b32.xlu1 %v2160_v34, %s2513_s8  ;;  %2218 = vrot.lane.b32.xlu0 %v2161_v35, %s2513_s8 }
 0x722   : > { %v2191_v10 = vpop.permute.xlu0 %2190  ;;  %v2189_v30 = vpop.permute.xlu1 %2188 }
 0x723   : > { %v2230_v26 = vsel %vm348_vm10, %v2189_v30, %v2191_v10  ;;  %v2163_v53 = vld [vmem:[#allocation2 + $0x88] sm:$0xff] }
 0x724   : > { %2265 = vst [vmem:[%s4051_s16] sm:$0xff] %v2230_v26  ;;  %2220 = vrot.lane.b32.xlu1 %v2124_v11, %s2513_s8  ;;  %2222 = vrot.lane.b32.xlu0 %v2163_v53, %s2513_s8 }
 0x726   : > { %v2195_v4 = vpop.permute.xlu0 %2194  ;;  %v2193_v19 = vpop.permute.xlu1 %2192 }
 0x727   : > { %v2231_v23 = vsel %vm348_vm10, %v2191_v10, %v2193_v19  ;;  %2267 = vst.msk [vmem:[%s4051_s16 + $0x10] sm:$0xff] %vm1760_vm6, %v2193_v19  ;;  %v2166_v54 = vld [vmem:[#allocation2 + $0xa0] sm:$0xf]  ;;  %v2165_v62 = vld [vmem:[#allocation2 + $0x98] sm:$0xf] }
 0x728   : > { %2266 = vst [vmem:[%s4051_s16 + $0x8] sm:$0xff] %v2231_v23  ;;  %2228 = vrot.lane.b32.xlu1 %v2166_v54, %s2513_s8  ;;  %2226 = vrot.lane.b32.xlu0 %v2165_v62, %s2513_s8 }
 0x72a   : > { %v2199_v57 = vpop.permute.xlu0 %2198  ;;  %v2197_v15 = vpop.permute.xlu1 %2196 }
 0x72b   : > { %2270 = vst.msk [vmem:[%s4051_s16 + $0x28] sm:$0xff] %vm1760_vm6, %v2199_v57  ;;  %v2232_v25 = vsel %vm348_vm10, %v2195_v4, %v2197_v15  ;;  %v2233_v1 = vsel %vm348_vm10, %v2197_v15, %v2199_v57 }
 0x72c   : > { %2268 = vst [vmem:[%s4051_s16 + $0x18] sm:$0xff] %v2232_v25  ;;  %2269 = vst [vmem:[%s4051_s16 + $0x20] sm:$0xff] %v2233_v1 }
 0x72e   : > { %v2203_v41 = vpop.permute.xlu0 %2202  ;;  %v2201_v43 = vpop.permute.xlu1 %2200 }
 0x72f   : > { %v2234_v8 = vsel %vm348_vm10, %v2201_v43, %v2203_v41 }
 0x730   : > { %2271 = vst [vmem:[%s4051_s16 + $0x30] sm:$0xff] %v2234_v8 }
 0x732   : > { %v2207_v24 = vpop.permute.xlu0 %2206  ;;  %v2205_v59 = vpop.permute.xlu1 %2204 }
 0x733   : > { %v2235_v61 = vsel %vm348_vm10, %v2203_v41, %v2205_v59  ;;  %2273 = vst.msk [vmem:[%s4051_s16 + $0x40] sm:$0xff] %vm1760_vm6, %v2205_v59 }
 0x734   : > { %2272 = vst [vmem:[%s4051_s16 + $0x38] sm:$0xff] %v2235_v61 }
 0x736   : > { %v2211_v14 = vpop.permute.xlu0 %2210  ;;  %v2209_v32 = vpop.permute.xlu1 %2208 }
 0x737   : > { %2276 = vst.msk [vmem:[%s4051_s16 + $0x58] sm:$0xff] %vm1760_vm6, %v2211_v14  ;;  %v2236_v47 = vsel %vm348_vm10, %v2207_v24, %v2209_v32  ;;  %v2237_v52 = vsel %vm348_vm10, %v2209_v32, %v2211_v14 }
 0x738   : > { %2274 = vst [vmem:[%s4051_s16 + $0x48] sm:$0xff] %v2236_v47  ;;  %2275 = vst [vmem:[%s4051_s16 + $0x50] sm:$0xff] %v2237_v52 }
 0x789   : > { %v2213_v44 = vpop.permute.xlu1 %2212 }
 0x78d   : > { %v2225_v42 = vpop.permute.xlu1 %2224 }
 0x78e   : > { %v2215_v12 = vpop.permute.xlu0 %2214 }
 0x78f   : > { %v2238_v21 = vsel %vm348_vm10, %v2213_v44, %v2215_v12 }
 0x790   : > { %2277 = vst [vmem:[%s4051_s16 + $0x60] sm:$0xff] %v2238_v21 }
 0x792   : > { %v2219_v58 = vpop.permute.xlu0 %2218  ;;  %v2217_v18 = vpop.permute.xlu1 %2216 }
 0x793   : > { %v2239_v33 = vsel %vm348_vm10, %v2215_v12, %v2217_v18  ;;  %2279 = vst.msk [vmem:[%s4051_s16 + $0x70] sm:$0xff] %vm1760_vm6, %v2217_v18 }
 0x794   : > { %2278 = vst [vmem:[%s4051_s16 + $0x68] sm:$0xff] %v2239_v33 }
 0x796   : > { %v2223_v37 = vpop.permute.xlu0 %2222  ;;  %v2221_v0 = vpop.permute.xlu1 %2220 }
 0x797   : > { %2282 = vst.msk [vmem:[%s4051_s16 + $0x88] sm:$0xff] %vm1760_vm6, %v2223_v37  ;;  %v2240_v13 = vsel %vm348_vm10, %v2219_v58, %v2221_v0  ;;  %v2241_v45 = vsel %vm348_vm10, %v2221_v0, %v2223_v37 }
 0x798   : > { %2280 = vst [vmem:[%s4051_s16 + $0x78] sm:$0xff] %v2240_v13  ;;  %2281 = vst [vmem:[%s4051_s16 + $0x80] sm:$0xff] %v2241_v45 }
 0x79a   : > { %v2227_v2 = vpop.permute.xlu0 %2226  ;;  %v2229_v22 = vpop.permute.xlu1 %2228 }
 0x79b   : > { %v2242_v9 = vsel %vm348_vm10, %v2225_v42, %v2227_v2  ;;  %v2243_v27 = vsel %vm348_vm10, %v2227_v2, %v2229_v22  ;;  %2286 = vst.msk [vmem:[%s4051_s16 + $0xa0] sm:$0xf] %vm2285_vm2, %v2229_v22 }
 0x79c   : > { %2283 = vst [vmem:[%s4051_s16 + $0x90] sm:$0xf] %v2242_v9  ;;  %2284 = vst [vmem:[%s4051_s16 + $0x98] sm:$0xf] %v2243_v27 }
 0x79d PF: > { %s16_s21 = sadd.s32 1, %s2506_s21  }
 0x79e   : > { %p13_p4 = scmp.ge.s32.totalorder %s16_s21, 4  }
 0x7a0   :  { %15 = sbr.rel (!%p13_p4) target bundleno = 1 (0x1), region = 74 }

</bundles_post_ra>
